<compile_context>
chip_gen: v7x
topology: tpu7x:2x2x1
jax: 0.10.0
libtpu: 0.0.40
codegen_flags: <defaults>
</compile_context>

<pallas_src>
import functools
import math

import jax
import jax.numpy as jnp
from jax.experimental import pallas as pl
from jax.experimental.pallas import tpu as pltpu


# Row layout of the packed per-layer "small vector" tile (layer_vec).
_ROW_BQKV, _ROW_BFF1, _ROW_BAO = 0, 1, 2        # self-attn in-proj bias, ffn b1, attn out bias
_ROW_N1G, _ROW_N1B = 3, 4                        # norm after self-attention
_ROW_BFF2, _ROW_NFG, _ROW_NFB = 5, 6, 7          # ffn b2, norm after ffn
_ROW_CABQ, _ROW_CABKV, _ROW_CABO = 8, 9, 10      # cross-attn biases (decoder only)
_ROW_N2G, _ROW_N2B = 11, 12                      # norm after cross-attention (decoder only)
_NUM_VEC_ROWS = 16                               # padded to a full sublane group


# ----------------------------------------------------------------------------
# In-kernel helpers
# ----------------------------------------------------------------------------
def _layernorm(x, gamma, beta, eps=1e-5):
    mean = jnp.mean(x, axis=-1, keepdims=True)
    var = jnp.mean((x - mean) ** 2, axis=-1, keepdims=True)   # biased, like torch
    return (x - mean) * jax.lax.rsqrt(var + eps) * gamma + beta


def _mha(q, k, v, nhead, mask):
    """Head-batched attention on 2-D (L, E) operands (one batch item)."""
    lq, e = q.shape
    lk = k.shape[0]
    hd = e // nhead
    scale = 1.0 / math.sqrt(hd)
    # TODO(synk): per review, try pltpu.einshape for the head split/merge and
    # verify in the MLIR that no materialized relayout copies remain; the
    # jnp reshape/transpose path below is the proven-lowering one at these
    # shapes so it is kept for robustness.
    qh = (q * scale).reshape(lq, nhead, hd).transpose(1, 0, 2)   # (H, Lq, hd)
    kh = k.reshape(lk, nhead, hd).transpose(1, 0, 2)             # (H, Lk, hd)
    vh = v.reshape(lk, nhead, hd).transpose(1, 0, 2)             # (H, Lk, hd)
    s = jnp.einsum("hqd,hkd->hqk", qh, kh,
                   preferred_element_type=jnp.float32)           # (H, Lq, Lk)
    if mask is not None:
        s = s + mask[None, :, :]
    s = s - jnp.max(s, axis=-1, keepdims=True)
    p = jnp.exp(s)
    p = p / jnp.sum(p, axis=-1, keepdims=True)                   # exact reciprocal
    o = jnp.einsum("hqk,hkd->hqd", p, vh,
                   preferred_element_type=jnp.float32)           # (H, Lq, hd)
    return o.transpose(1, 0, 2).reshape(lq, e)


def _dot(x, w):
    return jnp.dot(x, w, preferred_element_type=jnp.float32)


# ----------------------------------------------------------------------------
# Fused kernel: encoder stack + enc norm + decoder stack + dec norm + vocab.
# grid = (batch, 2*nlayers): batch "parallel", phase/layer "arbitrary".
# Steps 0..NL-1 are encoder layers, NL..2NL-1 are decoder layers.
# ----------------------------------------------------------------------------
def fused_kernel(src_ref, trg_ref, smask_ref, tmask_ref,
                 wqkv_ref, wao_ref, wff1_ref, wff2_ref,
                 wcaq_ref, wcakv_ref, wcao_ref,
                 lvec_ref, fnorm_ref, vpw_ref, vpb_ref,
                 logits_ref,
                 x_enc, x_dec, *, nhead):
    step = pl.program_id(1)
    nlayers = wcaq_ref.shape[0]
    e = wao_ref.shape[-1]
    f = wff1_ref.shape[-1]

    # ---- phase init: load the per-batch activation into resident scratch ----
    @pl.when(step == 0)
    def _():
        x_enc[...] = src_ref[0]

    @pl.when(step == nlayers)
    def _():
        x_dec[...] = trg_ref[0]

    # ---- resident per-layer weights: one dynamic-slice load each, no DMA ----
    vec = lvec_ref[step]                                   # (16, PW) packed tile
    b_qkv = vec[_ROW_BQKV:_ROW_BQKV + 1, :3 * e]
    b_ff1 = vec[_ROW_BFF1:_ROW_BFF1 + 1, :f]
    b_ao = vec[_ROW_BAO:_ROW_BAO + 1, :e]
    n1g, n1b = vec[_ROW_N1G:_ROW_N1G + 1, :e], vec[_ROW_N1B:_ROW_N1B + 1, :e]
    b_ff2 = vec[_ROW_BFF2:_ROW_BFF2 + 1, :e]
    nfg, nfb = vec[_ROW_NFG:_ROW_NFG + 1, :e], vec[_ROW_NFB:_ROW_NFB + 1, :e]

    wqkv = wqkv_ref[step]                                  # (E, 3E)
    wao = wao_ref[step]                                    # (E, E)
    wf1 = wff1_ref[step]                                   # (E, F)
    wf2 = wff2_ref[step]                                   # (F, E)

    def self_attn_block(x, mask):
        qkv = _dot(x, wqkv) + b_qkv
        a = _mha(qkv[:, :e], qkv[:, e:2 * e], qkv[:, 2 * e:], nhead, mask)
        y = _dot(a, wao) + b_ao
        return _layernorm(x + y, n1g, n1b)

    def ffn_block(x):
        h = jnp.maximum(_dot(x, wf1) + b_ff1, 0.0)
        y = _dot(h, wf2) + b_ff2
        return _layernorm(x + y, nfg, nfb)

    # ---- encoder phase ----
    @pl.when(step < nlayers)
    def _():
        x = self_attn_block(x_enc[...], smask_ref[...])    # reference masks encoder too
        x_enc[...] = ffn_block(x)

    # ---- final encoder LayerNorm -> memory (stays in VMEM scratch) ----
    @pl.when(step == nlayers - 1)
    def _():
        x_enc[...] = _layernorm(x_enc[...], fnorm_ref[0:1, :], fnorm_ref[1:2, :])

    # ---- decoder phase ----
    @pl.when(step >= nlayers)
    def _():
        l = step - nlayers
        x = self_attn_block(x_dec[...], tmask_ref[...])
        # cross-attention over encoder memory (no mask)
        ca_bq = vec[_ROW_CABQ:_ROW_CABQ + 1, :e]
        ca_bkv = vec[_ROW_CABKV:_ROW_CABKV + 1, :2 * e]
        ca_bo = vec[_ROW_CABO:_ROW_CABO + 1, :e]
        n2g, n2b = vec[_ROW_N2G:_ROW_N2G + 1, :e], vec[_ROW_N2B:_ROW_N2B + 1, :e]
        mem = x_enc[...]
        q = _dot(x, wcaq_ref[l]) + ca_bq
        kv = _dot(mem, wcakv_ref[l]) + ca_bkv
        a = _mha(q, kv[:, :e], kv[:, e:], nhead, None)
        y = _dot(a, wcao_ref[l]) + ca_bo
        x = _layernorm(x + y, n2g, n2b)
        x_dec[...] = ffn_block(x)

    # ---- final decoder LayerNorm + lane-dense (padded) vocab projection ----
    @pl.when(step == 2 * nlayers - 1)
    def _():
        xo = _layernorm(x_dec[...], fnorm_ref[2:3, :], fnorm_ref[3:4, :])
        logits_ref[0] = _dot(xo, vpw_ref[...]) + vpb_ref[...]


def fused_transformer(src_emb, trg_emb, src_mask, trg_mask, p, nhead):
    B, Ls, E = src_emb.shape
    Lt = trg_emb.shape[1]
    NL2 = p["w_qkv"].shape[0]              # 2 * num_layers (encoder then decoder)
    NL = NL2 // 2
    F = p["w_ff1"].shape[-1]
    Vpad = p["vp_w"].shape[-1]
    R, PW = p["layer_vec"].shape[1:]

    act = lambda b, s: (b, 0, 0)           # per-batch activation / logits block
    c3 = lambda b, s: (0, 0, 0)            # resident (constant index) 3-D block
    c2 = lambda b, s: (0, 0)               # resident (constant index) 2-D block

    kernel = functools.partial(fused_kernel, nhead=nhead)
    return pl.pallas_call(
        kernel,
        out_shape=jax.ShapeDtypeStruct((B, Lt, Vpad), jnp.float32),
        grid=(B, NL2),
        in_specs=[
            pl.BlockSpec((1, Ls, E), act),           # src embeddings
            pl.BlockSpec((1, Lt, E), act),           # trg embeddings
            pl.BlockSpec((Ls, Ls), c2),              # causal mask (encoder)
            pl.BlockSpec((Lt, Lt), c2),              # causal mask (decoder)
            pl.BlockSpec((NL2, E, 3 * E), c3),       # self-attn in-proj (enc|dec)
            pl.BlockSpec((NL2, E, E), c3),           # self-attn out-proj (enc|dec)
            pl.BlockSpec((NL2, E, F), c3),           # ffn w1 (enc|dec)
            pl.BlockSpec((NL2, F, E), c3),           # ffn w2 (enc|dec)
            pl.BlockSpec((NL, E, E), c3),            # cross-attn Wq
            pl.BlockSpec((NL, E, 2 * E), c3),        # cross-attn Wkv (fused)
            pl.BlockSpec((NL, E, E), c3),            # cross-attn Wo
            pl.BlockSpec((NL2, R, PW), c3),          # packed biases / LN params
            pl.BlockSpec((4, E), c2),                # final enc/dec norms
            pl.BlockSpec((E, Vpad), c2),             # vocab projection (padded)
            pl.BlockSpec((1, Vpad), c2),             # vocab bias (padded)
        ],
        out_specs=pl.BlockSpec((1, Lt, Vpad), act),
        scratch_shapes=[pltpu.VMEM((Ls, E), jnp.float32),    # encoder act / memory
                        pltpu.VMEM((Lt, E), jnp.float32)],   # decoder activation
        compiler_params=pltpu.CompilerParams(
            dimension_semantics=("parallel", "arbitrary")),
    )(src_emb, trg_emb, src_mask, trg_mask,
      p["w_qkv"], p["w_ao"], p["w_ff1"], p["w_ff2"],
      p["w_ca_q"], p["w_ca_kv"], p["w_ca_o"],
      p["layer_vec"], p["final_norms"], p["vp_w"], p["vp_b"])


# ----------------------------------------------------------------------------
# Parameter construction (stacked / packed layout for the fused kernel).
# ----------------------------------------------------------------------------
def sinusoidal_pe(max_len, d_model):
    pos = jnp.arange(max_len, dtype=jnp.float32)[:, None]
    div = jnp.exp(jnp.arange(0, d_model, 2, dtype=jnp.float32)
                  * (-math.log(10000.0) / d_model))
    pe = jnp.zeros((max_len, d_model), jnp.float32)
    pe = pe.at[:, 0::2].set(jnp.sin(pos * div))
    pe = pe.at[:, 1::2].set(jnp.cos(pos * div))
    return pe


def _linear(key, n_in, n_out):
    kw, kb = jax.random.split(key)
    bound = 1.0 / math.sqrt(n_in)
    w = jax.random.uniform(kw, (n_in, n_out), jnp.float32, -bound, bound)
    b = jax.random.uniform(kb, (n_out,), jnp.float32, -bound, bound)
    return w, b


def _ln_vec(E):
    return jnp.ones((E,), jnp.float32), jnp.zeros((E,), jnp.float32)


def _enc_layer(key, E, F):
    ks = jax.random.split(key, 6)
    wq, bq = _linear(ks[0], E, E)
    wk, bk = _linear(ks[1], E, E)
    wv, bv = _linear(ks[2], E, E)
    wo, bo = _linear(ks[3], E, E)
    w1, b1 = _linear(ks[4], E, F)
    w2, b2 = _linear(ks[5], F, E)
    n1g, n1b = _ln_vec(E)
    nfg, nfb = _ln_vec(E)
    return dict(wqkv=jnp.concatenate([wq, wk, wv], 1),
                bqkv=jnp.concatenate([bq, bk, bv], 0),
                wo=wo, bo=bo, w1=w1, b1=b1, w2=w2, b2=b2,
                n1g=n1g, n1b=n1b, nfg=nfg, nfb=nfb)


def _dec_layer(key, E, F):
    ks = jax.random.split(key, 10)
    wq, bq = _linear(ks[0], E, E)
    wk, bk = _linear(ks[1], E, E)
    wv, bv = _linear(ks[2], E, E)
    wo, bo = _linear(ks[3], E, E)
    cqw, cqb = _linear(ks[4], E, E)
    ckw, ckb = _linear(ks[5], E, E)
    cvw, cvb = _linear(ks[6], E, E)
    cow, cob = _linear(ks[7], E, E)
    w1, b1 = _linear(ks[8], E, F)
    w2, b2 = _linear(ks[9], F, E)
    n1g, n1b = _ln_vec(E)
    n2g, n2b = _ln_vec(E)
    nfg, nfb = _ln_vec(E)
    return dict(wqkv=jnp.concatenate([wq, wk, wv], 1),
                bqkv=jnp.concatenate([bq, bk, bv], 0),
                wo=wo, bo=bo,
                caq_w=cqw, caq_b=cqb,
                cakv_w=jnp.concatenate([ckw, cvw], 1),
                cakv_b=jnp.concatenate([ckb, cvb], 0),
                cao_w=cow, cao_b=cob,
                w1=w1, b1=b1, w2=w2, b2=b2,
                n1g=n1g, n1b=n1b, n2g=n2g, n2b=n2b, nfg=nfg, nfb=nfb)


def init_params(key, vocab, E, nhead, nlayers, F, max_len):
    assert E % nhead == 0
    pack_w = max(128, ((max(3 * E, 2 * E, F) + 127) // 128) * 128)

    keys = jax.random.split(key, 2 * nlayers + 2)
    params = {}
    params["embedding"] = jax.random.normal(keys[0], (vocab, E), jnp.float32)
    params["pe"] = sinusoidal_pe(max_len, E)

    enc = [_enc_layer(keys[1 + i], E, F) for i in range(nlayers)]
    dec = [_dec_layer(keys[1 + nlayers + i], E, F) for i in range(nlayers)]
    both = enc + dec

    params["w_qkv"] = jnp.stack([l["wqkv"] for l in both], 0)     # (2NL, E, 3E)
    params["w_ao"] = jnp.stack([l["wo"] for l in both], 0)        # (2NL, E, E)
    params["w_ff1"] = jnp.stack([l["w1"] for l in both], 0)       # (2NL, E, F)
    params["w_ff2"] = jnp.stack([l["w2"] for l in both], 0)       # (2NL, F, E)
    params["w_ca_q"] = jnp.stack([l["caq_w"] for l in dec], 0)    # (NL, E, E)
    params["w_ca_kv"] = jnp.stack([l["cakv_w"] for l in dec], 0)  # (NL, E, 2E)
    params["w_ca_o"] = jnp.stack([l["cao_w"] for l in dec], 0)    # (NL, E, E)

    def pack_vec(l, is_dec):
        v = jnp.zeros((_NUM_VEC_ROWS, pack_w), jnp.float32)
        v = v.at[_ROW_BQKV, :3 * E].set(l["bqkv"])
        v = v.at[_ROW_BFF1, :F].set(l["b1"])
        v = v.at[_ROW_BAO, :E].set(l["bo"])
        v = v.at[_ROW_N1G, :E].set(l["n1g"])
        v = v.at[_ROW_N1B, :E].set(l["n1b"])
        v = v.at[_ROW_BFF2, :E].set(l["b2"])
        v = v.at[_ROW_NFG, :E].set(l["nfg"])
        v = v.at[_ROW_NFB, :E].set(l["nfb"])
        if is_dec:
            v = v.at[_ROW_CABQ, :E].set(l["caq_b"])
            v = v.at[_ROW_CABKV, :2 * E].set(l["cakv_b"])
            v = v.at[_ROW_CABO, :E].set(l["cao_b"])
            v = v.at[_ROW_N2G, :E].set(l["n2g"])
            v = v.at[_ROW_N2B, :E].set(l["n2b"])
        return v

    params["layer_vec"] = jnp.stack(
        [pack_vec(l, False) for l in enc] + [pack_vec(l, True) for l in dec], 0)

    params["final_norms"] = jnp.stack(
        [jnp.ones(E), jnp.zeros(E), jnp.ones(E), jnp.zeros(E)], 0
    ).astype(jnp.float32)                                          # (4, E)

    vp_w, vp_b = _linear(keys[1 + 2 * nlayers], E, vocab)
    vpad = ((vocab + 127) // 128) * 128                            # lane-dense logits
    params["vp_w"] = jnp.zeros((E, vpad), jnp.float32).at[:, :vocab].set(vp_w)
    params["vp_b"] = jnp.zeros((1, vpad), jnp.float32).at[0, :vocab].set(vp_b)
    return params


# ----------------------------------------------------------------------------
# Full forward (embedding quirk + PE + fused transformer kernel + argmax).
# ----------------------------------------------------------------------------
@functools.partial(jax.jit, static_argnames=("nhead",))
def seq2seq_transformer_forward(params, src_ids, trg_ids, *, nhead):
    emb = params["embedding"]
    vocab, E = emb.shape
    sqrt_e = math.sqrt(E)

    def embed(ids):
        x = jnp.take(emb, ids, axis=0)              # (B, L, E)
        x = jnp.trunc(x) * sqrt_e                   # mimics .long() * sqrt(E)
        return x + params["pe"][: ids.shape[1]][None, :, :]

    def causal(L):
        r = jax.lax.broadcasted_iota(jnp.int32, (L, L), 0)
        c = jax.lax.broadcasted_iota(jnp.int32, (L, L), 1)
        return jnp.where(c <= r, 0.0, -1e30).astype(jnp.float32)

    src = embed(src_ids)                            # (B, Ls, E)
    trg = embed(trg_ids)                            # (B, Lt, E)

    logits_pad = fused_transformer(src, trg,
                                   causal(src_ids.shape[1]),
                                   causal(trg_ids.shape[1]),
                                   params, nhead)
    logits = logits_pad[:, :, :vocab]               # strip lane padding
    topi = jnp.argmax(logits, axis=-1)              # cheap XLA op on dense logits
    return topi, logits                             # (B, Lt), (B, Lt, vocab)


# ----------------------------------------------------------------------------
if __name__ == "__main__":
    VOCAB, EMB, NHEAD, NLAYERS, FFN = 64, 32, 2, 2, 64
    MAX_SEQ = 300
    B, LS, LT = 2, 8, 8

    root = jax.random.PRNGKey(0)
    k_param, k_src, k_trg = jax.random.split(root, 3)
    params = init_params(k_param, VOCAB, EMB, NHEAD, NLAYERS, FFN, MAX_SEQ)

    src = jax.random.randint(k_src, (B, LS), 0, VOCAB, dtype=jnp.int32)
    trg = jax.random.randint(k_trg, (B, LT), 0, VOCAB, dtype=jnp.int32)

    topi, logits = seq2seq_transformer_forward(params, src, trg, nhead=NHEAD)
    jax.block_until_ready((topi, logits))

    assert topi.shape == (B, LT)
    assert logits.shape == (B, LT, VOCAB)
    assert bool(jnp.all(jnp.isfinite(logits)))
    print("KERNEL_OK")
</pallas_src>

<mosaic_0001>
module attributes {stable_mosaic.version = 11 : i64} {
  func.func @fused_kernel(%arg0: i32, %arg1: i32, %arg2: memref<1x8x32xf32, #tpu.memory_space<vmem>>, %arg3: memref<1x8x32xf32, #tpu.memory_space<vmem>>, %arg4: memref<8x8xf32, #tpu.memory_space<vmem>>, %arg5: memref<8x8xf32, #tpu.memory_space<vmem>>, %arg6: memref<4x32x96xf32, #tpu.memory_space<vmem>>, %arg7: memref<4x32x32xf32, #tpu.memory_space<vmem>>, %arg8: memref<4x32x64xf32, #tpu.memory_space<vmem>>, %arg9: memref<4x64x32xf32, #tpu.memory_space<vmem>>, %arg10: memref<2x32x32xf32, #tpu.memory_space<vmem>>, %arg11: memref<2x32x64xf32, #tpu.memory_space<vmem>>, %arg12: memref<2x32x32xf32, #tpu.memory_space<vmem>>, %arg13: memref<4x16x128xf32, #tpu.memory_space<vmem>>, %arg14: memref<4x32xf32, #tpu.memory_space<vmem>>, %arg15: memref<32x128xf32, #tpu.memory_space<vmem>>, %arg16: memref<1x128xf32, #tpu.memory_space<vmem>>, %arg17: memref<1x8x128xf32, #tpu.memory_space<vmem>>, %arg18: memref<8x32xf32, #tpu.memory_space<vmem>>, %arg19: memref<8x32xf32, #tpu.memory_space<vmem>>) attributes {dimension_semantics = [#tpu.dimension_semantics<parallel>, #tpu.dimension_semantics<arbitrary>], iteration_bounds = array<i64: 2, 4>, scalar_prefetch = 0 : i64, scratch_operands = 2 : i64, tpu.core_type = #tpu.core_type<tc>, window_params = [{transform_indices = @transform_0, window_bounds = array<i64: 1, 8, 32>}, {transform_indices = @transform_1, window_bounds = array<i64: 1, 8, 32>}, {pipeline_mode = #tpu.pipeline_mode<synchronous>, transform_indices = @transform_2, window_bounds = array<i64: 8, 8>}, {pipeline_mode = #tpu.pipeline_mode<synchronous>, transform_indices = @transform_3, window_bounds = array<i64: 8, 8>}, {pipeline_mode = #tpu.pipeline_mode<synchronous>, transform_indices = @transform_4, window_bounds = array<i64: 4, 32, 96>}, {pipeline_mode = #tpu.pipeline_mode<synchronous>, transform_indices = @transform_5, window_bounds = array<i64: 4, 32, 32>}, {pipeline_mode = #tpu.pipeline_mode<synchronous>, transform_indices = @transform_6, window_bounds = array<i64: 4, 32, 64>}, {pipeline_mode = #tpu.pipeline_mode<synchronous>, transform_indices = @transform_7, window_bounds = array<i64: 4, 64, 32>}, {pipeline_mode = #tpu.pipeline_mode<synchronous>, transform_indices = @transform_8, window_bounds = array<i64: 2, 32, 32>}, {pipeline_mode = #tpu.pipeline_mode<synchronous>, transform_indices = @transform_9, window_bounds = array<i64: 2, 32, 64>}, {pipeline_mode = #tpu.pipeline_mode<synchronous>, transform_indices = @transform_10, window_bounds = array<i64: 2, 32, 32>}, {pipeline_mode = #tpu.pipeline_mode<synchronous>, transform_indices = @transform_11, window_bounds = array<i64: 4, 16, 128>}, {pipeline_mode = #tpu.pipeline_mode<synchronous>, transform_indices = @transform_12, window_bounds = array<i64: 4, 32>}, {pipeline_mode = #tpu.pipeline_mode<synchronous>, transform_indices = @transform_13, window_bounds = array<i64: 32, 128>}, {pipeline_mode = #tpu.pipeline_mode<synchronous>, transform_indices = @transform_14, window_bounds = array<i64: 1, 128>}, {transform_indices = @transform_15, window_bounds = array<i64: 1, 8, 128>}]} {
    %c0_i32 = arith.constant 0 : i32
    %0 = arith.cmpi eq, %arg1, %c0_i32 : i32
    %1 = arith.extui %0 : i1 to i32
    %c0_i32_0 = arith.constant 0 : i32
    %2 = arith.cmpi ne, %1, %c0_i32_0 : i32
    scf.if %2 {
      %c0_17 = arith.constant 0 : index
      %c0_18 = arith.constant 0 : index
      %c0_19 = arith.constant 0 : index
      %41 = vector.load %arg2[%c0_17, %c0_18, %c0_19] : memref<1x8x32xf32, #tpu.memory_space<vmem>>, vector<1x8x32xf32>
      %42 = vector.shape_cast %41 : vector<1x8x32xf32> to vector<8x32xf32>
      %c0_20 = arith.constant 0 : index
      %c0_21 = arith.constant 0 : index
      %43 = vector.load %arg18[%c0_20, %c0_21] : memref<8x32xf32, #tpu.memory_space<vmem>>, vector<8x32xf32>
      tpu.vector_store %arg18[%c0_20, %c0_21], %42 {strides = array<i32>} : memref<8x32xf32, #tpu.memory_space<vmem>>, vector<8x32xf32>,
    } else {
    }
    %c2_i32 = arith.constant 2 : i32
    %3 = arith.cmpi eq, %arg1, %c2_i32 : i32
    %4 = arith.extui %3 : i1 to i32
    %c0_i32_1 = arith.constant 0 : i32
    %5 = arith.cmpi ne, %4, %c0_i32_1 : i32
    scf.if %5 {
      %c0_17 = arith.constant 0 : index
      %c0_18 = arith.constant 0 : index
      %c0_19 = arith.constant 0 : index
      %41 = vector.load %arg3[%c0_17, %c0_18, %c0_19] : memref<1x8x32xf32, #tpu.memory_space<vmem>>, vector<1x8x32xf32>
      %42 = vector.shape_cast %41 : vector<1x8x32xf32> to vector<8x32xf32>
      %c0_20 = arith.constant 0 : index
      %c0_21 = arith.constant 0 : index
      %43 = vector.load %arg19[%c0_20, %c0_21] : memref<8x32xf32, #tpu.memory_space<vmem>>, vector<8x32xf32>
      tpu.vector_store %arg19[%c0_20, %c0_21], %42 {strides = array<i32>} : memref<8x32xf32, #tpu.memory_space<vmem>>, vector<8x32xf32>,
    } else {
    }
    %6 = arith.index_cast %arg1 : i32 to index
    %c0 = arith.constant 0 : index
    %c0_2 = arith.constant 0 : index
    %7 = vector.load %arg13[%6, %c0, %c0_2] : memref<4x16x128xf32, #tpu.memory_space<vmem>>, vector<1x16x128xf32>
    %8 = vector.shape_cast %7 : vector<1x16x128xf32> to vector<16x128xf32>
    %9 = vector.extract_strided_slice %8 {offsets = [0, 0], sizes = [1, 96], strides = [1, 1]} : vector<16x128xf32> to vector<1x96xf32>
    %10 = vector.extract_strided_slice %8 {offsets = [1, 0], sizes = [1, 64], strides = [1, 1]} : vector<16x128xf32> to vector<1x64xf32>
    %11 = vector.extract_strided_slice %8 {offsets = [2, 0], sizes = [1, 32], strides = [1, 1]} : vector<16x128xf32> to vector<1x32xf32>
    %12 = vector.extract_strided_slice %8 {offsets = [3, 0], sizes = [1, 32], strides = [1, 1]} : vector<16x128xf32> to vector<1x32xf32>
    %13 = vector.extract_strided_slice %8 {offsets = [4, 0], sizes = [1, 32], strides = [1, 1]} : vector<16x128xf32> to vector<1x32xf32>
    %14 = vector.extract_strided_slice %8 {offsets = [5, 0], sizes = [1, 32], strides = [1, 1]} : vector<16x128xf32> to vector<1x32xf32>
    %15 = vector.extract_strided_slice %8 {offsets = [6, 0], sizes = [1, 32], strides = [1, 1]} : vector<16x128xf32> to vector<1x32xf32>
    %16 = vector.extract_strided_slice %8 {offsets = [7, 0], sizes = [1, 32], strides = [1, 1]} : vector<16x128xf32> to vector<1x32xf32>
    %17 = arith.index_cast %arg1 : i32 to index
    %c0_3 = arith.constant 0 : index
    %c0_4 = arith.constant 0 : index
    %18 = vector.load %arg6[%17, %c0_3, %c0_4] : memref<4x32x96xf32, #tpu.memory_space<vmem>>, vector<1x32x96xf32>
    %19 = vector.shape_cast %18 : vector<1x32x96xf32> to vector<32x96xf32>
    %20 = arith.index_cast %arg1 : i32 to index
    %c0_5 = arith.constant 0 : index
    %c0_6 = arith.constant 0 : index
    %21 = vector.load %arg7[%20, %c0_5, %c0_6] : memref<4x32x32xf32, #tpu.memory_space<vmem>>, vector<1x32x32xf32>
    %22 = vector.shape_cast %21 : vector<1x32x32xf32> to vector<32x32xf32>
    %23 = arith.index_cast %arg1 : i32 to index
    %c0_7 = arith.constant 0 : index
    %c0_8 = arith.constant 0 : index
    %24 = vector.load %arg8[%23, %c0_7, %c0_8] : memref<4x32x64xf32, #tpu.memory_space<vmem>>, vector<1x32x64xf32>
    %25 = vector.shape_cast %24 : vector<1x32x64xf32> to vector<32x64xf32>
    %26 = arith.index_cast %arg1 : i32 to index
    %c0_9 = arith.constant 0 : index
    %c0_10 = arith.constant 0 : index
    %27 = vector.load %arg9[%26, %c0_9, %c0_10] : memref<4x64x32xf32, #tpu.memory_space<vmem>>, vector<1x64x32xf32>
    %28 = vector.shape_cast %27 : vector<1x64x32xf32> to vector<64x32xf32>
    %c2_i32_11 = arith.constant 2 : i32
    %29 = arith.cmpi slt, %arg1, %c2_i32_11 : i32
    %30 = arith.extui %29 : i1 to i32
    %c0_i32_12 = arith.constant 0 : i32
    %31 = arith.cmpi ne, %30, %c0_i32_12 : i32
    scf.if %31 {
      %c0_17 = arith.constant 0 : index
      %c0_18 = arith.constant 0 : index
      %41 = vector.load %arg18[%c0_17, %c0_18] : memref<8x32xf32, #tpu.memory_space<vmem>>, vector<8x32xf32>
      %c0_19 = arith.constant 0 : index
      %c0_20 = arith.constant 0 : index
      %42 = vector.load %arg4[%c0_19, %c0_20] : memref<8x8xf32, #tpu.memory_space<vmem>>, vector<8x8xf32>
      %cst = arith.constant dense<0.000000e+00> : vector<8x96xf32>
      %43 = tpu.matmul %41, %19, %cst {dimension_numbers = #tpu.dot_dimension_numbers<[1], [0], [0], [1], [0, 0, 1, 1], [], []>} : vector<8x32xf32>, vector<32x96xf32>, vector<8x96xf32> -> vector<8x96xf32>
      %44 = vector.broadcast %9 : vector<1x96xf32> to vector<8x96xf32>
      %45 = arith.addf %43, %44 : vector<8x96xf32>
      %46 = vector.extract_strided_slice %45 {offsets = [0, 0], sizes = [8, 32], strides = [1, 1]} : vector<8x96xf32> to vector<8x32xf32>
      %47 = vector.extract_strided_slice %45 {offsets = [0, 32], sizes = [8, 32], strides = [1, 1]} : vector<8x96xf32> to vector<8x32xf32>
      %48 = vector.extract_strided_slice %45 {offsets = [0, 64], sizes = [8, 32], strides = [1, 1]} : vector<8x96xf32> to vector<8x32xf32>
      %cst_21 = arith.constant 2.500000e-01 : f32
      %49 = vector.broadcast %cst_21 : f32 to vector<8x32xf32>
      %50 = arith.mulf %46, %49 : vector<8x32xf32>
      %51 = vector.shape_cast %50 : vector<8x32xf32> to vector<8x2x16xf32>
      %52 = tpu.transpose %51, [1, 0, 2] : vector<8x2x16xf32> -> vector<2x8x16xf32>
      %53 = vector.shape_cast %47 : vector<8x32xf32> to vector<8x2x16xf32>
      %54 = tpu.transpose %53, [1, 0, 2] : vector<8x2x16xf32> -> vector<2x8x16xf32>
      %55 = vector.shape_cast %48 : vector<8x32xf32> to vector<8x2x16xf32>
      %56 = tpu.transpose %55, [1, 0, 2] : vector<8x2x16xf32> -> vector<2x8x16xf32>
      "tpu.trace_start"() <{level = 10 : i32, message = "hqd,hkd->hqk"}> : () -> ()
      %cst_22 = arith.constant dense<0.000000e+00> : vector<2x8x8xf32>
      %57 = tpu.matmul %52, %54, %cst_22 {dimension_numbers = #tpu.dot_dimension_numbers<[2], [2], [1], [1], [0, 0, 0, 1, 1, 1], [0], [0]>} : vector<2x8x16xf32>, vector<2x8x16xf32>, vector<2x8x8xf32> -> vector<2x8x8xf32>
      "tpu.trace_stop"() : () -> ()
      %58 = vector.shape_cast %42 : vector<8x8xf32> to vector<1x8x8xf32>
      %59 = vector.broadcast %58 : vector<1x8x8xf32> to vector<2x8x8xf32>
      %60 = arith.addf %57, %59 : vector<2x8x8xf32>
      %cst_23 = arith.constant dense<0xFF800000> : vector<2x8xf32>
      %61 = vector.multi_reduction <maximumf>, %60, %cst_23 [2] : vector<2x8x8xf32> to vector<2x8xf32>
      %62 = vector.shape_cast %61 : vector<2x8xf32> to vector<2x8x1xf32>
      %63 = vector.broadcast %62 : vector<2x8x1xf32> to vector<2x8x8xf32>
      %64 = arith.subf %60, %63 : vector<2x8x8xf32>
      %65 = math.exp %64 : vector<2x8x8xf32>
      %cst_24 = arith.constant dense<0.000000e+00> : vector<2x8xf32>
      %66 = vector.multi_reduction <add>, %65, %cst_24 [2] : vector<2x8x8xf32> to vector<2x8xf32>
      %67 = vector.shape_cast %66 : vector<2x8xf32> to vector<2x8x1xf32>
      %68 = vector.broadcast %67 : vector<2x8x1xf32> to vector<2x8x8xf32>
      %69 = arith.divf %65, %68 : vector<2x8x8xf32>
      "tpu.trace_start"() <{level = 10 : i32, message = "hqk,hkd->hqd"}> : () -> ()
      %cst_25 = arith.constant dense<0.000000e+00> : vector<2x8x16xf32>
      %70 = tpu.matmul %69, %56, %cst_25 {dimension_numbers = #tpu.dot_dimension_numbers<[2], [1], [1], [2], [0, 0, 0, 1, 1, 2], [0], [0]>} : vector<2x8x8xf32>, vector<2x8x16xf32>, vector<2x8x16xf32> -> vector<2x8x16xf32>
      "tpu.trace_stop"() : () -> ()
      %71 = tpu.transpose %70, [1, 0, 2] : vector<2x8x16xf32> -> vector<8x2x16xf32>
      %72 = vector.shape_cast %71 : vector<8x2x16xf32> to vector<8x32xf32>
      %cst_26 = arith.constant dense<0.000000e+00> : vector<8x32xf32>
      %73 = tpu.matmul %72, %22, %cst_26 {dimension_numbers = #tpu.dot_dimension_numbers<[1], [0], [0], [1], [0, 0, 1, 1], [], []>} : vector<8x32xf32>, vector<32x32xf32>, vector<8x32xf32> -> vector<8x32xf32>
      %74 = vector.broadcast %11 : vector<1x32xf32> to vector<8x32xf32>
      %75 = arith.addf %73, %74 : vector<8x32xf32>
      %76 = arith.addf %41, %75 : vector<8x32xf32>
      %cst_27 = arith.constant dense<0.000000e+00> : vector<8xf32>
      %77 = vector.multi_reduction <add>, %76, %cst_27 [1] : vector<8x32xf32> to vector<8xf32>
      %78 = vector.shape_cast %77 : vector<8xf32> to vector<8x1xf32>
      %cst_28 = arith.constant 3.200000e+01 : f32
      %79 = vector.broadcast %cst_28 : f32 to vector<8x1xf32>
      %80 = arith.divf %78, %79 : vector<8x1xf32>
      %81 = vector.broadcast %80 : vector<8x1xf32> to vector<8x32xf32>
      %82 = arith.subf %76, %81 : vector<8x32xf32>
      %83 = arith.mulf %82, %82 : vector<8x32xf32>
      %cst_29 = arith.constant dense<0.000000e+00> : vector<8xf32>
      %84 = vector.multi_reduction <add>, %83, %cst_29 [1] : vector<8x32xf32> to vector<8xf32>
      %85 = vector.shape_cast %84 : vector<8xf32> to vector<8x1xf32>
      %cst_30 = arith.constant 3.200000e+01 : f32
      %86 = vector.broadcast %cst_30 : f32 to vector<8x1xf32>
      %87 = arith.divf %85, %86 : vector<8x1xf32>
      %88 = vector.broadcast %80 : vector<8x1xf32> to vector<8x32xf32>
      %89 = arith.subf %76, %88 : vector<8x32xf32>
      %cst_31 = arith.constant 9.99999974E-6 : f32
      %90 = vector.broadcast %cst_31 : f32 to vector<8x1xf32>
      %91 = arith.addf %87, %90 : vector<8x1xf32>
      %92 = math.rsqrt %91 : vector<8x1xf32>
      %93 = vector.broadcast %92 : vector<8x1xf32> to vector<8x32xf32>
      %94 = arith.mulf %89, %93 : vector<8x32xf32>
      %95 = vector.broadcast %12 : vector<1x32xf32> to vector<8x32xf32>
      %96 = arith.mulf %94, %95 : vector<8x32xf32>
      %97 = vector.broadcast %13 : vector<1x32xf32> to vector<8x32xf32>
      %98 = arith.addf %96, %97 : vector<8x32xf32>
      %cst_32 = arith.constant dense<0.000000e+00> : vector<8x64xf32>
      %99 = tpu.matmul %98, %25, %cst_32 {dimension_numbers = #tpu.dot_dimension_numbers<[1], [0], [0], [1], [0, 0, 1, 1], [], []>} : vector<8x32xf32>, vector<32x64xf32>, vector<8x64xf32> -> vector<8x64xf32>
      %100 = vector.broadcast %10 : vector<1x64xf32> to vector<8x64xf32>
      %101 = arith.addf %99, %100 : vector<8x64xf32>
      %cst_33 = arith.constant 0.000000e+00 : f32
      %102 = vector.broadcast %cst_33 : f32 to vector<8x64xf32>
      %103 = arith.maximumf %101, %102 : vector<8x64xf32>
      %cst_34 = arith.constant dense<0.000000e+00> : vector<8x32xf32>
      %104 = tpu.matmul %103, %28, %cst_34 {dimension_numbers = #tpu.dot_dimension_numbers<[1], [0], [0], [1], [0, 0, 1, 1], [], []>} : vector<8x64xf32>, vector<64x32xf32>, vector<8x32xf32> -> vector<8x32xf32>
      %105 = vector.broadcast %14 : vector<1x32xf32> to vector<8x32xf32>
      %106 = arith.addf %104, %105 : vector<8x32xf32>
      %107 = arith.addf %98, %106 : vector<8x32xf32>
      %cst_35 = arith.constant dense<0.000000e+00> : vector<8xf32>
      %108 = vector.multi_reduction <add>, %107, %cst_35 [1] : vector<8x32xf32> to vector<8xf32>
      %109 = vector.shape_cast %108 : vector<8xf32> to vector<8x1xf32>
      %cst_36 = arith.constant 3.200000e+01 : f32
      %110 = vector.broadcast %cst_36 : f32 to vector<8x1xf32>
      %111 = arith.divf %109, %110 : vector<8x1xf32>
      %112 = vector.broadcast %111 : vector<8x1xf32> to vector<8x32xf32>
      %113 = arith.subf %107, %112 : vector<8x32xf32>
      %114 = arith.mulf %113, %113 : vector<8x32xf32>
      %cst_37 = arith.constant dense<0.000000e+00> : vector<8xf32>
      %115 = vector.multi_reduction <add>, %114, %cst_37 [1] : vector<8x32xf32> to vector<8xf32>
      %116 = vector.shape_cast %115 : vector<8xf32> to vector<8x1xf32>
      %cst_38 = arith.constant 3.200000e+01 : f32
      %117 = vector.broadcast %cst_38 : f32 to vector<8x1xf32>
      %118 = arith.divf %116, %117 : vector<8x1xf32>
      %119 = vector.broadcast %111 : vector<8x1xf32> to vector<8x32xf32>
      %120 = arith.subf %107, %119 : vector<8x32xf32>
      %cst_39 = arith.constant 9.99999974E-6 : f32
      %121 = vector.broadcast %cst_39 : f32 to vector<8x1xf32>
      %122 = arith.addf %118, %121 : vector<8x1xf32>
      %123 = math.rsqrt %122 : vector<8x1xf32>
      %124 = vector.broadcast %123 : vector<8x1xf32> to vector<8x32xf32>
      %125 = arith.mulf %120, %124 : vector<8x32xf32>
      %126 = vector.broadcast %15 : vector<1x32xf32> to vector<8x32xf32>
      %127 = arith.mulf %125, %126 : vector<8x32xf32>
      %128 = vector.broadcast %16 : vector<1x32xf32> to vector<8x32xf32>
      %129 = arith.addf %127, %128 : vector<8x32xf32>
      %c0_40 = arith.constant 0 : index
      %c0_41 = arith.constant 0 : index
      %130 = vector.load %arg18[%c0_40, %c0_41] : memref<8x32xf32, #tpu.memory_space<vmem>>, vector<8x32xf32>
      tpu.vector_store %arg18[%c0_40, %c0_41], %129 {strides = array<i32>} : memref<8x32xf32, #tpu.memory_space<vmem>>, vector<8x32xf32>,
    } else {
    }
    %c1_i32 = arith.constant 1 : i32
    %32 = arith.cmpi eq, %arg1, %c1_i32 : i32
    %33 = arith.extui %32 : i1 to i32
    %c0_i32_13 = arith.constant 0 : i32
    %34 = arith.cmpi ne, %33, %c0_i32_13 : i32
    scf.if %34 {
      %c0_17 = arith.constant 0 : index
      %c0_18 = arith.constant 0 : index
      %41 = vector.load %arg18[%c0_17, %c0_18] : memref<8x32xf32, #tpu.memory_space<vmem>>, vector<8x32xf32>
      %c0_19 = arith.constant 0 : index
      %c0_20 = arith.constant 0 : index
      %42 = vector.load %arg14[%c0_19, %c0_20] : memref<4x32xf32, #tpu.memory_space<vmem>>, vector<1x32xf32>
      %c1 = arith.constant 1 : index
      %c0_21 = arith.constant 0 : index
      %43 = vector.load %arg14[%c1, %c0_21] : memref<4x32xf32, #tpu.memory_space<vmem>>, vector<1x32xf32>
      %cst = arith.constant dense<0.000000e+00> : vector<8xf32>
      %44 = vector.multi_reduction <add>, %41, %cst [1] : vector<8x32xf32> to vector<8xf32>
      %45 = vector.shape_cast %44 : vector<8xf32> to vector<8x1xf32>
      %cst_22 = arith.constant 3.200000e+01 : f32
      %46 = vector.broadcast %cst_22 : f32 to vector<8x1xf32>
      %47 = arith.divf %45, %46 : vector<8x1xf32>
      %48 = vector.broadcast %47 : vector<8x1xf32> to vector<8x32xf32>
      %49 = arith.subf %41, %48 : vector<8x32xf32>
      %50 = arith.mulf %49, %49 : vector<8x32xf32>
      %cst_23 = arith.constant dense<0.000000e+00> : vector<8xf32>
      %51 = vector.multi_reduction <add>, %50, %cst_23 [1] : vector<8x32xf32> to vector<8xf32>
      %52 = vector.shape_cast %51 : vector<8xf32> to vector<8x1xf32>
      %cst_24 = arith.constant 3.200000e+01 : f32
      %53 = vector.broadcast %cst_24 : f32 to vector<8x1xf32>
      %54 = arith.divf %52, %53 : vector<8x1xf32>
      %55 = vector.broadcast %47 : vector<8x1xf32> to vector<8x32xf32>
      %56 = arith.subf %41, %55 : vector<8x32xf32>
      %cst_25 = arith.constant 9.99999974E-6 : f32
      %57 = vector.broadcast %cst_25 : f32 to vector<8x1xf32>
      %58 = arith.addf %54, %57 : vector<8x1xf32>
      %59 = math.rsqrt %58 : vector<8x1xf32>
      %60 = vector.broadcast %59 : vector<8x1xf32> to vector<8x32xf32>
      %61 = arith.mulf %56, %60 : vector<8x32xf32>
      %62 = vector.broadcast %42 : vector<1x32xf32> to vector<8x32xf32>
      %63 = arith.mulf %61, %62 : vector<8x32xf32>
      %64 = vector.broadcast %43 : vector<1x32xf32> to vector<8x32xf32>
      %65 = arith.addf %63, %64 : vector<8x32xf32>
      %c0_26 = arith.constant 0 : index
      %c0_27 = arith.constant 0 : index
      %66 = vector.load %arg18[%c0_26, %c0_27] : memref<8x32xf32, #tpu.memory_space<vmem>>, vector<8x32xf32>
      tpu.vector_store %arg18[%c0_26, %c0_27], %65 {strides = array<i32>} : memref<8x32xf32, #tpu.memory_space<vmem>>, vector<8x32xf32>,
    } else {
    }
    %c2_i32_14 = arith.constant 2 : i32
    %35 = arith.cmpi sge, %arg1, %c2_i32_14 : i32
    %36 = arith.extui %35 : i1 to i32
    %c0_i32_15 = arith.constant 0 : i32
    %37 = arith.cmpi ne, %36, %c0_i32_15 : i32
    scf.if %37 {
      %c2_i32_17 = arith.constant 2 : i32
      %41 = arith.subi %arg1, %c2_i32_17 : i32
      %c0_18 = arith.constant 0 : index
      %c0_19 = arith.constant 0 : index
      %42 = vector.load %arg19[%c0_18, %c0_19] : memref<8x32xf32, #tpu.memory_space<vmem>>, vector<8x32xf32>
      %c0_20 = arith.constant 0 : index
      %c0_21 = arith.constant 0 : index
      %43 = vector.load %arg5[%c0_20, %c0_21] : memref<8x8xf32, #tpu.memory_space<vmem>>, vector<8x8xf32>
      %cst = arith.constant dense<0.000000e+00> : vector<8x96xf32>
      %44 = tpu.matmul %42, %19, %cst {dimension_numbers = #tpu.dot_dimension_numbers<[1], [0], [0], [1], [0, 0, 1, 1], [], []>} : vector<8x32xf32>, vector<32x96xf32>, vector<8x96xf32> -> vector<8x96xf32>
      %45 = vector.broadcast %9 : vector<1x96xf32> to vector<8x96xf32>
      %46 = arith.addf %44, %45 : vector<8x96xf32>
      %47 = vector.extract_strided_slice %46 {offsets = [0, 0], sizes = [8, 32], strides = [1, 1]} : vector<8x96xf32> to vector<8x32xf32>
      %48 = vector.extract_strided_slice %46 {offsets = [0, 32], sizes = [8, 32], strides = [1, 1]} : vector<8x96xf32> to vector<8x32xf32>
      %49 = vector.extract_strided_slice %46 {offsets = [0, 64], sizes = [8, 32], strides = [1, 1]} : vector<8x96xf32> to vector<8x32xf32>
      %cst_22 = arith.constant 2.500000e-01 : f32
      %50 = vector.broadcast %cst_22 : f32 to vector<8x32xf32>
      %51 = arith.mulf %47, %50 : vector<8x32xf32>
      %52 = vector.shape_cast %51 : vector<8x32xf32> to vector<8x2x16xf32>
      %53 = tpu.transpose %52, [1, 0, 2] : vector<8x2x16xf32> -> vector<2x8x16xf32>
      %54 = vector.shape_cast %48 : vector<8x32xf32> to vector<8x2x16xf32>
      %55 = tpu.transpose %54, [1, 0, 2] : vector<8x2x16xf32> -> vector<2x8x16xf32>
      %56 = vector.shape_cast %49 : vector<8x32xf32> to vector<8x2x16xf32>
      %57 = tpu.transpose %56, [1, 0, 2] : vector<8x2x16xf32> -> vector<2x8x16xf32>
      "tpu.trace_start"() <{level = 10 : i32, message = "hqd,hkd->hqk"}> : () -> ()
      %cst_23 = arith.constant dense<0.000000e+00> : vector<2x8x8xf32>
      %58 = tpu.matmul %53, %55, %cst_23 {dimension_numbers = #tpu.dot_dimension_numbers<[2], [2], [1], [1], [0, 0, 0, 1, 1, 1], [0], [0]>} : vector<2x8x16xf32>, vector<2x8x16xf32>, vector<2x8x8xf32> -> vector<2x8x8xf32>
      "tpu.trace_stop"() : () -> ()
      %59 = vector.shape_cast %43 : vector<8x8xf32> to vector<1x8x8xf32>
      %60 = vector.broadcast %59 : vector<1x8x8xf32> to vector<2x8x8xf32>
      %61 = arith.addf %58, %60 : vector<2x8x8xf32>
      %cst_24 = arith.constant dense<0xFF800000> : vector<2x8xf32>
      %62 = vector.multi_reduction <maximumf>, %61, %cst_24 [2] : vector<2x8x8xf32> to vector<2x8xf32>
      %63 = vector.shape_cast %62 : vector<2x8xf32> to vector<2x8x1xf32>
      %64 = vector.broadcast %63 : vector<2x8x1xf32> to vector<2x8x8xf32>
      %65 = arith.subf %61, %64 : vector<2x8x8xf32>
      %66 = math.exp %65 : vector<2x8x8xf32>
      %cst_25 = arith.constant dense<0.000000e+00> : vector<2x8xf32>
      %67 = vector.multi_reduction <add>, %66, %cst_25 [2] : vector<2x8x8xf32> to vector<2x8xf32>
      %68 = vector.shape_cast %67 : vector<2x8xf32> to vector<2x8x1xf32>
      %69 = vector.broadcast %68 : vector<2x8x1xf32> to vector<2x8x8xf32>
      %70 = arith.divf %66, %69 : vector<2x8x8xf32>
      "tpu.trace_start"() <{level = 10 : i32, message = "hqk,hkd->hqd"}> : () -> ()
      %cst_26 = arith.constant dense<0.000000e+00> : vector<2x8x16xf32>
      %71 = tpu.matmul %70, %57, %cst_26 {dimension_numbers = #tpu.dot_dimension_numbers<[2], [1], [1], [2], [0, 0, 0, 1, 1, 2], [0], [0]>} : vector<2x8x8xf32>, vector<2x8x16xf32>, vector<2x8x16xf32> -> vector<2x8x16xf32>
      "tpu.trace_stop"() : () -> ()
      %72 = tpu.transpose %71, [1, 0, 2] : vector<2x8x16xf32> -> vector<8x2x16xf32>
      %73 = vector.shape_cast %72 : vector<8x2x16xf32> to vector<8x32xf32>
      %cst_27 = arith.constant dense<0.000000e+00> : vector<8x32xf32>
      %74 = tpu.matmul %73, %22, %cst_27 {dimension_numbers = #tpu.dot_dimension_numbers<[1], [0], [0], [1], [0, 0, 1, 1], [], []>} : vector<8x32xf32>, vector<32x32xf32>, vector<8x32xf32> -> vector<8x32xf32>
      %75 = vector.broadcast %11 : vector<1x32xf32> to vector<8x32xf32>
      %76 = arith.addf %74, %75 : vector<8x32xf32>
      %77 = arith.addf %42, %76 : vector<8x32xf32>
      %cst_28 = arith.constant dense<0.000000e+00> : vector<8xf32>
      %78 = vector.multi_reduction <add>, %77, %cst_28 [1] : vector<8x32xf32> to vector<8xf32>
      %79 = vector.shape_cast %78 : vector<8xf32> to vector<8x1xf32>
      %cst_29 = arith.constant 3.200000e+01 : f32
      %80 = vector.broadcast %cst_29 : f32 to vector<8x1xf32>
      %81 = arith.divf %79, %80 : vector<8x1xf32>
      %82 = vector.broadcast %81 : vector<8x1xf32> to vector<8x32xf32>
      %83 = arith.subf %77, %82 : vector<8x32xf32>
      %84 = arith.mulf %83, %83 : vector<8x32xf32>
      %cst_30 = arith.constant dense<0.000000e+00> : vector<8xf32>
      %85 = vector.multi_reduction <add>, %84, %cst_30 [1] : vector<8x32xf32> to vector<8xf32>
      %86 = vector.shape_cast %85 : vector<8xf32> to vector<8x1xf32>
      %cst_31 = arith.constant 3.200000e+01 : f32
      %87 = vector.broadcast %cst_31 : f32 to vector<8x1xf32>
      %88 = arith.divf %86, %87 : vector<8x1xf32>
      %89 = vector.broadcast %81 : vector<8x1xf32> to vector<8x32xf32>
      %90 = arith.subf %77, %89 : vector<8x32xf32>
      %cst_32 = arith.constant 9.99999974E-6 : f32
      %91 = vector.broadcast %cst_32 : f32 to vector<8x1xf32>
      %92 = arith.addf %88, %91 : vector<8x1xf32>
      %93 = math.rsqrt %92 : vector<8x1xf32>
      %94 = vector.broadcast %93 : vector<8x1xf32> to vector<8x32xf32>
      %95 = arith.mulf %90, %94 : vector<8x32xf32>
      %96 = vector.broadcast %12 : vector<1x32xf32> to vector<8x32xf32>
      %97 = arith.mulf %95, %96 : vector<8x32xf32>
      %98 = vector.broadcast %13 : vector<1x32xf32> to vector<8x32xf32>
      %99 = arith.addf %97, %98 : vector<8x32xf32>
      %100 = vector.extract_strided_slice %8 {offsets = [8, 0], sizes = [1, 32], strides = [1, 1]} : vector<16x128xf32> to vector<1x32xf32>
      %101 = vector.extract_strided_slice %8 {offsets = [9, 0], sizes = [1, 64], strides = [1, 1]} : vector<16x128xf32> to vector<1x64xf32>
      %102 = vector.extract_strided_slice %8 {offsets = [10, 0], sizes = [1, 32], strides = [1, 1]} : vector<16x128xf32> to vector<1x32xf32>
      %103 = vector.extract_strided_slice %8 {offsets = [11, 0], sizes = [1, 32], strides = [1, 1]} : vector<16x128xf32> to vector<1x32xf32>
      %104 = vector.extract_strided_slice %8 {offsets = [12, 0], sizes = [1, 32], strides = [1, 1]} : vector<16x128xf32> to vector<1x32xf32>
      %c0_33 = arith.constant 0 : index
      %c0_34 = arith.constant 0 : index
      %105 = vector.load %arg18[%c0_33, %c0_34] : memref<8x32xf32, #tpu.memory_space<vmem>>, vector<8x32xf32>
      %106 = arith.index_cast %41 : i32 to index
      %c0_35 = arith.constant 0 : index
      %c0_36 = arith.constant 0 : index
      %107 = vector.load %arg10[%106, %c0_35, %c0_36] : memref<2x32x32xf32, #tpu.memory_space<vmem>>, vector<1x32x32xf32>
      %108 = vector.shape_cast %107 : vector<1x32x32xf32> to vector<32x32xf32>
      %cst_37 = arith.constant dense<0.000000e+00> : vector<8x32xf32>
      %109 = tpu.matmul %99, %108, %cst_37 {dimension_numbers = #tpu.dot_dimension_numbers<[1], [0], [0], [1], [0, 0, 1, 1], [], []>} : vector<8x32xf32>, vector<32x32xf32>, vector<8x32xf32> -> vector<8x32xf32>
      %110 = vector.broadcast %100 : vector<1x32xf32> to vector<8x32xf32>
      %111 = arith.addf %109, %110 : vector<8x32xf32>
      %112 = arith.index_cast %41 : i32 to index
      %c0_38 = arith.constant 0 : index
      %c0_39 = arith.constant 0 : index
      %113 = vector.load %arg11[%112, %c0_38, %c0_39] : memref<2x32x64xf32, #tpu.memory_space<vmem>>, vector<1x32x64xf32>
      %114 = vector.shape_cast %113 : vector<1x32x64xf32> to vector<32x64xf32>
      %cst_40 = arith.constant dense<0.000000e+00> : vector<8x64xf32>
      %115 = tpu.matmul %105, %114, %cst_40 {dimension_numbers = #tpu.dot_dimension_numbers<[1], [0], [0], [1], [0, 0, 1, 1], [], []>} : vector<8x32xf32>, vector<32x64xf32>, vector<8x64xf32> -> vector<8x64xf32>
      %116 = vector.broadcast %101 : vector<1x64xf32> to vector<8x64xf32>
      %117 = arith.addf %115, %116 : vector<8x64xf32>
      %118 = vector.extract_strided_slice %117 {offsets = [0, 0], sizes = [8, 32], strides = [1, 1]} : vector<8x64xf32> to vector<8x32xf32>
      %119 = vector.extract_strided_slice %117 {offsets = [0, 32], sizes = [8, 32], strides = [1, 1]} : vector<8x64xf32> to vector<8x32xf32>
      %cst_41 = arith.constant 2.500000e-01 : f32
      %120 = vector.broadcast %cst_41 : f32 to vector<8x32xf32>
      %121 = arith.mulf %111, %120 : vector<8x32xf32>
      %122 = vector.shape_cast %121 : vector<8x32xf32> to vector<8x2x16xf32>
      %123 = tpu.transpose %122, [1, 0, 2] : vector<8x2x16xf32> -> vector<2x8x16xf32>
      %124 = vector.shape_cast %118 : vector<8x32xf32> to vector<8x2x16xf32>
      %125 = tpu.transpose %124, [1, 0, 2] : vector<8x2x16xf32> -> vector<2x8x16xf32>
      %126 = vector.shape_cast %119 : vector<8x32xf32> to vector<8x2x16xf32>
      %127 = tpu.transpose %126, [1, 0, 2] : vector<8x2x16xf32> -> vector<2x8x16xf32>
      "tpu.trace_start"() <{level = 10 : i32, message = "hqd,hkd->hqk"}> : () -> ()
      %cst_42 = arith.constant dense<0.000000e+00> : vector<2x8x8xf32>
      %128 = tpu.matmul %123, %125, %cst_42 {dimension_numbers = #tpu.dot_dimension_numbers<[2], [2], [1], [1], [0, 0, 0, 1, 1, 1], [0], [0]>} : vector<2x8x16xf32>, vector<2x8x16xf32>, vector<2x8x8xf32> -> vector<2x8x8xf32>
      "tpu.trace_stop"() : () -> ()
      %cst_43 = arith.constant dense<0xFF800000> : vector<2x8xf32>
      %129 = vector.multi_reduction <maximumf>, %128, %cst_43 [2] : vector<2x8x8xf32> to vector<2x8xf32>
      %130 = vector.shape_cast %129 : vector<2x8xf32> to vector<2x8x1xf32>
      %131 = vector.broadcast %130 : vector<2x8x1xf32> to vector<2x8x8xf32>
      %132 = arith.subf %128, %131 : vector<2x8x8xf32>
      %133 = math.exp %132 : vector<2x8x8xf32>
      %cst_44 = arith.constant dense<0.000000e+00> : vector<2x8xf32>
      %134 = vector.multi_reduction <add>, %133, %cst_44 [2] : vector<2x8x8xf32> to vector<2x8xf32>
      %135 = vector.shape_cast %134 : vector<2x8xf32> to vector<2x8x1xf32>
      %136 = vector.broadcast %135 : vector<2x8x1xf32> to vector<2x8x8xf32>
      %137 = arith.divf %133, %136 : vector<2x8x8xf32>
      "tpu.trace_start"() <{level = 10 : i32, message = "hqk,hkd->hqd"}> : () -> ()
      %cst_45 = arith.constant dense<0.000000e+00> : vector<2x8x16xf32>
      %138 = tpu.matmul %137, %127, %cst_45 {dimension_numbers = #tpu.dot_dimension_numbers<[2], [1], [1], [2], [0, 0, 0, 1, 1, 2], [0], [0]>} : vector<2x8x8xf32>, vector<2x8x16xf32>, vector<2x8x16xf32> -> vector<2x8x16xf32>
      "tpu.trace_stop"() : () -> ()
      %139 = tpu.transpose %138, [1, 0, 2] : vector<2x8x16xf32> -> vector<8x2x16xf32>
      %140 = vector.shape_cast %139 : vector<8x2x16xf32> to vector<8x32xf32>
      %141 = arith.index_cast %41 : i32 to index
      %c0_46 = arith.constant 0 : index
      %c0_47 = arith.constant 0 : index
      %142 = vector.load %arg12[%141, %c0_46, %c0_47] : memref<2x32x32xf32, #tpu.memory_space<vmem>>, vector<1x32x32xf32>
      %143 = vector.shape_cast %142 : vector<1x32x32xf32> to vector<32x32xf32>
      %cst_48 = arith.constant dense<0.000000e+00> : vector<8x32xf32>
      %144 = tpu.matmul %140, %143, %cst_48 {dimension_numbers = #tpu.dot_dimension_numbers<[1], [0], [0], [1], [0, 0, 1, 1], [], []>} : vector<8x32xf32>, vector<32x32xf32>, vector<8x32xf32> -> vector<8x32xf32>
      %145 = vector.broadcast %102 : vector<1x32xf32> to vector<8x32xf32>
      %146 = arith.addf %144, %145 : vector<8x32xf32>
      %147 = arith.addf %99, %146 : vector<8x32xf32>
      %cst_49 = arith.constant dense<0.000000e+00> : vector<8xf32>
      %148 = vector.multi_reduction <add>, %147, %cst_49 [1] : vector<8x32xf32> to vector<8xf32>
      %149 = vector.shape_cast %148 : vector<8xf32> to vector<8x1xf32>
      %cst_50 = arith.constant 3.200000e+01 : f32
      %150 = vector.broadcast %cst_50 : f32 to vector<8x1xf32>
      %151 = arith.divf %149, %150 : vector<8x1xf32>
      %152 = vector.broadcast %151 : vector<8x1xf32> to vector<8x32xf32>
      %153 = arith.subf %147, %152 : vector<8x32xf32>
      %154 = arith.mulf %153, %153 : vector<8x32xf32>
      %cst_51 = arith.constant dense<0.000000e+00> : vector<8xf32>
      %155 = vector.multi_reduction <add>, %154, %cst_51 [1] : vector<8x32xf32> to vector<8xf32>
      %156 = vector.shape_cast %155 : vector<8xf32> to vector<8x1xf32>
      %cst_52 = arith.constant 3.200000e+01 : f32
      %157 = vector.broadcast %cst_52 : f32 to vector<8x1xf32>
      %158 = arith.divf %156, %157 : vector<8x1xf32>
      %159 = vector.broadcast %151 : vector<8x1xf32> to vector<8x32xf32>
      %160 = arith.subf %147, %159 : vector<8x32xf32>
      %cst_53 = arith.constant 9.99999974E-6 : f32
      %161 = vector.broadcast %cst_53 : f32 to vector<8x1xf32>
      %162 = arith.addf %158, %161 : vector<8x1xf32>
      %163 = math.rsqrt %162 : vector<8x1xf32>
      %164 = vector.broadcast %163 : vector<8x1xf32> to vector<8x32xf32>
      %165 = arith.mulf %160, %164 : vector<8x32xf32>
      %166 = vector.broadcast %103 : vector<1x32xf32> to vector<8x32xf32>
      %167 = arith.mulf %165, %166 : vector<8x32xf32>
      %168 = vector.broadcast %104 : vector<1x32xf32> to vector<8x32xf32>
      %169 = arith.addf %167, %168 : vector<8x32xf32>
      %cst_54 = arith.constant dense<0.000000e+00> : vector<8x64xf32>
      %170 = tpu.matmul %169, %25, %cst_54 {dimension_numbers = #tpu.dot_dimension_numbers<[1], [0], [0], [1], [0, 0, 1, 1], [], []>} : vector<8x32xf32>, vector<32x64xf32>, vector<8x64xf32> -> vector<8x64xf32>
      %171 = vector.broadcast %10 : vector<1x64xf32> to vector<8x64xf32>
      %172 = arith.addf %170, %171 : vector<8x64xf32>
      %cst_55 = arith.constant 0.000000e+00 : f32
      %173 = vector.broadcast %cst_55 : f32 to vector<8x64xf32>
      %174 = arith.maximumf %172, %173 : vector<8x64xf32>
      %cst_56 = arith.constant dense<0.000000e+00> : vector<8x32xf32>
      %175 = tpu.matmul %174, %28, %cst_56 {dimension_numbers = #tpu.dot_dimension_numbers<[1], [0], [0], [1], [0, 0, 1, 1], [], []>} : vector<8x64xf32>, vector<64x32xf32>, vector<8x32xf32> -> vector<8x32xf32>
      %176 = vector.broadcast %14 : vector<1x32xf32> to vector<8x32xf32>
      %177 = arith.addf %175, %176 : vector<8x32xf32>
      %178 = arith.addf %169, %177 : vector<8x32xf32>
      %cst_57 = arith.constant dense<0.000000e+00> : vector<8xf32>
      %179 = vector.multi_reduction <add>, %178, %cst_57 [1] : vector<8x32xf32> to vector<8xf32>
      %180 = vector.shape_cast %179 : vector<8xf32> to vector<8x1xf32>
      %cst_58 = arith.constant 3.200000e+01 : f32
      %181 = vector.broadcast %cst_58 : f32 to vector<8x1xf32>
      %182 = arith.divf %180, %181 : vector<8x1xf32>
      %183 = vector.broadcast %182 : vector<8x1xf32> to vector<8x32xf32>
      %184 = arith.subf %178, %183 : vector<8x32xf32>
      %185 = arith.mulf %184, %184 : vector<8x32xf32>
      %cst_59 = arith.constant dense<0.000000e+00> : vector<8xf32>
      %186 = vector.multi_reduction <add>, %185, %cst_59 [1] : vector<8x32xf32> to vector<8xf32>
      %187 = vector.shape_cast %186 : vector<8xf32> to vector<8x1xf32>
      %cst_60 = arith.constant 3.200000e+01 : f32
      %188 = vector.broadcast %cst_60 : f32 to vector<8x1xf32>
      %189 = arith.divf %187, %188 : vector<8x1xf32>
      %190 = vector.broadcast %182 : vector<8x1xf32> to vector<8x32xf32>
      %191 = arith.subf %178, %190 : vector<8x32xf32>
      %cst_61 = arith.constant 9.99999974E-6 : f32
      %192 = vector.broadcast %cst_61 : f32 to vector<8x1xf32>
      %193 = arith.addf %189, %192 : vector<8x1xf32>
      %194 = math.rsqrt %193 : vector<8x1xf32>
      %195 = vector.broadcast %194 : vector<8x1xf32> to vector<8x32xf32>
      %196 = arith.mulf %191, %195 : vector<8x32xf32>
      %197 = vector.broadcast %15 : vector<1x32xf32> to vector<8x32xf32>
      %198 = arith.mulf %196, %197 : vector<8x32xf32>
      %199 = vector.broadcast %16 : vector<1x32xf32> to vector<8x32xf32>
      %200 = arith.addf %198, %199 : vector<8x32xf32>
      %c0_62 = arith.constant 0 : index
      %c0_63 = arith.constant 0 : index
      %201 = vector.load %arg19[%c0_62, %c0_63] : memref<8x32xf32, #tpu.memory_space<vmem>>, vector<8x32xf32>
      tpu.vector_store %arg19[%c0_62, %c0_63], %200 {strides = array<i32>} : memref<8x32xf32, #tpu.memory_space<vmem>>, vector<8x32xf32>,
    } else {
    }
    %c3_i32 = arith.constant 3 : i32
    %38 = arith.cmpi eq, %arg1, %c3_i32 : i32
    %39 = arith.extui %38 : i1 to i32
    %c0_i32_16 = arith.constant 0 : i32
    %40 = arith.cmpi ne, %39, %c0_i32_16 : i32
    scf.if %40 {
      %c0_17 = arith.constant 0 : index
      %c0_18 = arith.constant 0 : index
      %41 = vector.load %arg19[%c0_17, %c0_18] : memref<8x32xf32, #tpu.memory_space<vmem>>, vector<8x32xf32>
      %c2 = arith.constant 2 : index
      %c0_19 = arith.constant 0 : index
      %42 = vector.load %arg14[%c2, %c0_19] : memref<4x32xf32, #tpu.memory_space<vmem>>, vector<1x32xf32>
      %c3 = arith.constant 3 : index
      %c0_20 = arith.constant 0 : index
      %43 = vector.load %arg14[%c3, %c0_20] : memref<4x32xf32, #tpu.memory_space<vmem>>, vector<1x32xf32>
      %cst = arith.constant dense<0.000000e+00> : vector<8xf32>
      %44 = vector.multi_reduction <add>, %41, %cst [1] : vector<8x32xf32> to vector<8xf32>
      %45 = vector.shape_cast %44 : vector<8xf32> to vector<8x1xf32>
      %cst_21 = arith.constant 3.200000e+01 : f32
      %46 = vector.broadcast %cst_21 : f32 to vector<8x1xf32>
      %47 = arith.divf %45, %46 : vector<8x1xf32>
      %48 = vector.broadcast %47 : vector<8x1xf32> to vector<8x32xf32>
      %49 = arith.subf %41, %48 : vector<8x32xf32>
      %50 = arith.mulf %49, %49 : vector<8x32xf32>
      %cst_22 = arith.constant dense<0.000000e+00> : vector<8xf32>
      %51 = vector.multi_reduction <add>, %50, %cst_22 [1] : vector<8x32xf32> to vector<8xf32>
      %52 = vector.shape_cast %51 : vector<8xf32> to vector<8x1xf32>
      %cst_23 = arith.constant 3.200000e+01 : f32
      %53 = vector.broadcast %cst_23 : f32 to vector<8x1xf32>
      %54 = arith.divf %52, %53 : vector<8x1xf32>
      %55 = vector.broadcast %47 : vector<8x1xf32> to vector<8x32xf32>
      %56 = arith.subf %41, %55 : vector<8x32xf32>
      %cst_24 = arith.constant 9.99999974E-6 : f32
      %57 = vector.broadcast %cst_24 : f32 to vector<8x1xf32>
      %58 = arith.addf %54, %57 : vector<8x1xf32>
      %59 = math.rsqrt %58 : vector<8x1xf32>
      %60 = vector.broadcast %59 : vector<8x1xf32> to vector<8x32xf32>
      %61 = arith.mulf %56, %60 : vector<8x32xf32>
      %62 = vector.broadcast %42 : vector<1x32xf32> to vector<8x32xf32>
      %63 = arith.mulf %61, %62 : vector<8x32xf32>
      %64 = vector.broadcast %43 : vector<1x32xf32> to vector<8x32xf32>
      %65 = arith.addf %63, %64 : vector<8x32xf32>
      %c0_25 = arith.constant 0 : index
      %c0_26 = arith.constant 0 : index
      %66 = vector.load %arg15[%c0_25, %c0_26] : memref<32x128xf32, #tpu.memory_space<vmem>>, vector<32x128xf32>
      %cst_27 = arith.constant dense<0.000000e+00> : vector<8x128xf32>
      %67 = tpu.matmul %65, %66, %cst_27 {dimension_numbers = #tpu.dot_dimension_numbers<[1], [0], [0], [1], [0, 0, 1, 1], [], []>} : vector<8x32xf32>, vector<32x128xf32>, vector<8x128xf32> -> vector<8x128xf32>
      %c0_28 = arith.constant 0 : index
      %c0_29 = arith.constant 0 : index
      %68 = vector.load %arg16[%c0_28, %c0_29] : memref<1x128xf32, #tpu.memory_space<vmem>>, vector<1x128xf32>
      %69 = vector.broadcast %68 : vector<1x128xf32> to vector<8x128xf32>
      %70 = arith.addf %67, %69 : vector<8x128xf32>
      %c0_30 = arith.constant 0 : index
      %c0_31 = arith.constant 0 : index
      %c0_32 = arith.constant 0 : index
      %71 = vector.load %arg17[%c0_30, %c0_31, %c0_32] : memref<1x8x128xf32, #tpu.memory_space<vmem>>, vector<1x8x128xf32>
      %72 = vector.shape_cast %71 : vector<1x8x128xf32> to vector<8x128xf32>
      %73 = vector.shape_cast %70 : vector<8x128xf32> to vector<1x8x128xf32>
      tpu.vector_store %arg17[%c0_30, %c0_31, %c0_32], %73 {strides = array<i32>} : memref<1x8x128xf32, #tpu.memory_space<vmem>>, vector<1x8x128xf32>,
    } else {
    }
    return
  }
  func.func @transform_0(%arg0: i32, %arg1: i32) -> (i32, i32, i32) {
    %c0_i32 = arith.constant 0 : i32
    %c0_i32_0 = arith.constant 0 : i32
    %c0_i32_1 = arith.constant 0 : i32
    return %arg0, %c0_i32, %c0_i32_0 : i32, i32, i32
  }
  func.func @transform_1(%arg0: i32, %arg1: i32) -> (i32, i32, i32) {
    %c0_i32 = arith.constant 0 : i32
    %c0_i32_0 = arith.constant 0 : i32
    %c0_i32_1 = arith.constant 0 : i32
    return %arg0, %c0_i32, %c0_i32_0 : i32, i32, i32
  }
  func.func @transform_2(%arg0: i32, %arg1: i32) -> (i32, i32) {
    %c0_i32 = arith.constant 0 : i32
    %c0_i32_0 = arith.constant 0 : i32
    %c0_i32_1 = arith.constant 0 : i32
    return %c0_i32, %c0_i32_0 : i32, i32
  }
  func.func @transform_3(%arg0: i32, %arg1: i32) -> (i32, i32) {
    %c0_i32 = arith.constant 0 : i32
    %c0_i32_0 = arith.constant 0 : i32
    %c0_i32_1 = arith.constant 0 : i32
    return %c0_i32, %c0_i32_0 : i32, i32
  }
  func.func @transform_4(%arg0: i32, %arg1: i32) -> (i32, i32, i32) {
    %c0_i32 = arith.constant 0 : i32
    %c0_i32_0 = arith.constant 0 : i32
    %c0_i32_1 = arith.constant 0 : i32
    %c0_i32_2 = arith.constant 0 : i32
    return %c0_i32, %c0_i32_0, %c0_i32_1 : i32, i32, i32
  }
  func.func @transform_5(%arg0: i32, %arg1: i32) -> (i32, i32, i32) {
    %c0_i32 = arith.constant 0 : i32
    %c0_i32_0 = arith.constant 0 : i32
    %c0_i32_1 = arith.constant 0 : i32
    %c0_i32_2 = arith.constant 0 : i32
    return %c0_i32, %c0_i32_0, %c0_i32_1 : i32, i32, i32
  }
  func.func @transform_6(%arg0: i32, %arg1: i32) -> (i32, i32, i32) {
    %c0_i32 = arith.constant 0 : i32
    %c0_i32_0 = arith.constant 0 : i32
    %c0_i32_1 = arith.constant 0 : i32
    %c0_i32_2 = arith.constant 0 : i32
    return %c0_i32, %c0_i32_0, %c0_i32_1 : i32, i32, i32
  }
  func.func @transform_7(%arg0: i32, %arg1: i32) -> (i32, i32, i32) {
    %c0_i32 = arith.constant 0 : i32
    %c0_i32_0 = arith.constant 0 : i32
    %c0_i32_1 = arith.constant 0 : i32
    %c0_i32_2 = arith.constant 0 : i32
    return %c0_i32, %c0_i32_0, %c0_i32_1 : i32, i32, i32
  }
  func.func @transform_8(%arg0: i32, %arg1: i32) -> (i32, i32, i32) {
    %c0_i32 = arith.constant 0 : i32
    %c0_i32_0 = arith.constant 0 : i32
    %c0_i32_1 = arith.constant 0 : i32
    %c0_i32_2 = arith.constant 0 : i32
    return %c0_i32, %c0_i32_0, %c0_i32_1 : i32, i32, i32
  }
  func.func @transform_9(%arg0: i32, %arg1: i32) -> (i32, i32, i32) {
    %c0_i32 = arith.constant 0 : i32
    %c0_i32_0 = arith.constant 0 : i32
    %c0_i32_1 = arith.constant 0 : i32
    %c0_i32_2 = arith.constant 0 : i32
    return %c0_i32, %c0_i32_0, %c0_i32_1 : i32, i32, i32
  }
  func.func @transform_10(%arg0: i32, %arg1: i32) -> (i32, i32, i32) {
    %c0_i32 = arith.constant 0 : i32
    %c0_i32_0 = arith.constant 0 : i32
    %c0_i32_1 = arith.constant 0 : i32
    %c0_i32_2 = arith.constant 0 : i32
    return %c0_i32, %c0_i32_0, %c0_i32_1 : i32, i32, i32
  }
  func.func @transform_11(%arg0: i32, %arg1: i32) -> (i32, i32, i32) {
    %c0_i32 = arith.constant 0 : i32
    %c0_i32_0 = arith.constant 0 : i32
    %c0_i32_1 = arith.constant 0 : i32
    %c0_i32_2 = arith.constant 0 : i32
    return %c0_i32, %c0_i32_0, %c0_i32_1 : i32, i32, i32
  }
  func.func @transform_12(%arg0: i32, %arg1: i32) -> (i32, i32) {
    %c0_i32 = arith.constant 0 : i32
    %c0_i32_0 = arith.constant 0 : i32
    %c0_i32_1 = arith.constant 0 : i32
    return %c0_i32, %c0_i32_0 : i32, i32
  }
  func.func @transform_13(%arg0: i32, %arg1: i32) -> (i32, i32) {
    %c0_i32 = arith.constant 0 : i32
    %c0_i32_0 = arith.constant 0 : i32
    %c0_i32_1 = arith.constant 0 : i32
    return %c0_i32, %c0_i32_0 : i32, i32
  }
  func.func @transform_14(%arg0: i32, %arg1: i32) -> (i32, i32) {
    %c0_i32 = arith.constant 0 : i32
    %c0_i32_0 = arith.constant 0 : i32
    %c0_i32_1 = arith.constant 0 : i32
    return %c0_i32, %c0_i32_0 : i32, i32
  }
  func.func @transform_15(%arg0: i32, %arg1: i32) -> (i32, i32, i32) {
    %c0_i32 = arith.constant 0 : i32
    %c0_i32_0 = arith.constant 0 : i32
    %c0_i32_1 = arith.constant 0 : i32
    return %arg0, %c0_i32, %c0_i32_0 : i32, i32, i32
  }
}

</mosaic_0001>

<bundles_post_ra>
// kernel: seq2seq_transformer_forward.1
= control target key start
LH: loop header
LB: loop body
LE: loop exit
PB: predicated region body
PF: predicated region fallthrough
CT: control target
= control target key end

     0   :  { %s4942_s18 = smov 0   ;;  %s4944_s19 = smov 0   ;;  %s5626_s0 = inlined_call_operand.vmem [shape: f32[2,8,32], index: 0, kind: input, shape index: {}]   ;;  %s5627_s1 = inlined_call_operand.vmem [shape: f32[2,8,32], index: 1, kind: input, shape index: {}]   ;;  %s5628_s2 = inlined_call_operand.vmem [shape: f32[8,8], index: 2, kind: input, shape index: {}, may-alias: {2,3}]   ;;  %s5629_s3 = inlined_call_operand.vmem [shape: f32[8,8], index: 3, kind: input, shape index: {}, may-alias: {2,3}]   ;;  %s5630_s4 = inlined_call_operand.vmem [shape: f32[4,32,96], index: 4, kind: input, shape index: {}]   ;;  %s5631_s5 = inlined_call_operand.vmem [shape: f32[4,32,32], index: 5, kind: input, shape index: {}]   ;;  %s5632_s6 = inlined_call_operand.vmem [shape: f32[4,32,64], index: 6, kind: input, shape index: {}]   ;;  %s5633_s7 = inlined_call_operand.vmem [shape: f32[4,64,32], index: 7, kind: input, shape index: {}]   ;;  %s5634_s8 = inlined_call_operand.vmem [shape: f32[2,32,32], index: 8, kind: input, shape index: {}]   ;;  %s5635_s9 = inlined_call_operand.vmem [shape: f32[2,32,64], index: 9, kind: input, shape index: {}]   ;;  %s5636_s10 = inlined_call_operand.vmem [shape: f32[2,32,32], index: 10, kind: input, shape index: {}]   ;;  %s5637_s11 = inlined_call_operand.vmem [shape: f32[4,16,128], index: 11, kind: input, shape index: {}]   ;;  %s5638_s12 = inlined_call_operand.vmem [shape: f32[4,32], index: 12, kind: input, shape index: {}]   ;;  %s5639_s13 = inlined_call_operand.vmem [shape: f32[32,128], index: 13, kind: input, shape index: {}]   ;;  %s5640_s14 = inlined_call_operand.vmem [shape: f32[1,128], index: 14, kind: input, shape index: {}]   ;;  %s5641_s15 = inlined_call_operand.vmem [shape: f32[2,8,128], index: 15, kind: output, shape index: {}]  }
   0x1   :  { %5644 = sst [smem:[#allocation8_spill]] %s5626_s0  ;;  %s4946_s20 = smov 0  }
   0x2   :  { %5645 = sst [smem:[#allocation9_spill]] %s5627_s1  ;;  %s4948_s21 = smov 0  }
   0x3   :  { %s4950_s22 = smov 0  }
   0x4 LB: > { %5646 = sst [smem:[#allocation4_spill]] %s4831_s20  ;;  %s34_s23 = sadd.s32 1, %s4831_s20  ;;  %s4839_s22 = sphi %s4950_s22, %s25_s22   ;;  %s4835_s21 = sphi %s4948_s21, %s5656_s21   ;;  %s4831_s20 = sphi %s4946_s20, %s5655_s20   ;;  %s4827_s19 = sphi %s4944_s19, %s5654_s19   ;;  %s4823_s18 = sphi %s4942_s18, %s5653_s18  }
   0x5   : > { %5647 = sst [smem:[#allocation5_spill]] %s4835_s21  ;;  %s37_s24 = sadd.s32 1, %s4835_s21 }
   0x6   : > { %p35_p0 = scmp.ge.s32.totalorder %s34_s23, 4  ;;  %p4242_p1 = scmp.ge.s32.totalorder %s4839_s22, 1 }
   0x7   : > { %p457_p2 = scmp.lt.s32.totalorder %s4839_s22, 9 }
   0x8   : > { %s5658_s23 = smov (%p35_p0, %s34_s23), 0  ;;  %s5660_s24 = smov (!%p35_p0, %s37_s24), %s4835_s21 }
   0x9   : > { %5648 = sst [smem:[#allocation6_spill]] %s5658_s23  ;;  %p458_p3 = pnand %p4242_p1, %p457_p2 }
   0xa   : > { %p39_p4 = scmp.ge.s32.totalorder %s5660_s24, 2  ;;  %p507_p5 = scmp.lt.s32.totalorder (!%p458_p3), %s4827_s19, 1 }
   0xb   : > { %461 = sbr.rel (%p458_p3) target bundleno = 7937 (0x1f01), region = 80  ;;  %s5650_s0 = sld [smem:[#allocation8_spill]] (!%p458_p3) }
   0xc   : > { %s5662_s24 = smov (%p39_p4, %s5660_s24), 0  ;;  %s5651_s1 = sld [smem:[#allocation9_spill]] (!%p458_p3) }
   0xd   : > { %5649 = sst [smem:[#allocation7_spill]] %s5662_s24  ;;  %p4246_p6 = scmp.ne.s32.totalorder (!%p458_p3), %s4823_s18, 0 }
  0x12   : > { %s5664_s19 = smov (!%p507_p5, %s4827_s19), 1  ;;  %522 = sbr.rel (%p4246_p6) target bundleno = 25 (0x19), region = 84 }
  0x13   : > { %s4974_s25 = sshll.u32 %s5664_s19, 3  ;;  %vm524_vm0 = vcmask (!%p4246_p6), 261120  }
  0x14   : > { %s510_s28 = scalar_lea.vmem %s5650_s0, %s4974_s25  ;;  %s514_s16 = scalar_lea.vmem %s5651_s1, %s4974_s25 }
  0x15   : > { %v523_v0 = vld [vmem:[%s510_s28] sm:$0xff] (!%p4246_p6) }
  0x16   : > { %525 = vst.msk [vmem:[#allocation2] sm:$0xff] (!%p4246_p6), %vm524_vm0, %v523_v0 }
  0x19 PF: > { %p4247_p7 = scmp.ne.s32.totalorder %s4823_s18, 2 }
  0x1a   : > { %v530_v1 = vld [vmem:[%s514_s16] sm:$0xff] (!%p4247_p7)  ;;  %vm531_vm1 = vcmask (!%p4247_p7), 261120  }
  0x1b   : > { %529 = sbr.rel (%p4247_p7) target bundleno = 34 (0x22), region = 88  ;;  %532 = vst.msk [vmem:[#allocation3] sm:$0xff] (!%p4247_p7), %vm531_vm1, %v530_v1 }
  0x22 PF: > { %s4248_s19 = sshll.u32 %s4823_s18, 4  ;;  %s4249_s23 = sshll.u32 %s4823_s18, 5 }
  0x23   : > { %s534_s29 = scalar_lea.vmem %s5637_s11, %s4248_s19  ;;  %s538_s17 = scalar_lea.vmem %s5630_s4, %s4249_s23 }
  0x24   : > { %v4998_v2 = vld [vmem:[%s534_s29] sm:$0xff]  ;;  %v5000_v3 = vld [vmem:[%s534_s29 + $0x8] sm:$0xff]  ;;  %s543_s0 = scalar_lea.vmem %s5631_s5, %s4249_s23  ;;  %s548_s20 = scalar_lea.vmem %s5632_s6, %s4249_s23  ;;  %v5012_v6 = vld [vmem:[%s538_s17 + $0x10] sm:$0xff] }
  0x25   : > { %v5002_v4 = vld [vmem:[%s538_s17] sm:$0xff]  ;;  %v5010_v5 = vld [vmem:[%s538_s17 + $0x8] sm:$0xff]  ;;  %v5014_v7 = vld [vmem:[%s538_s17 + $0x18] sm:$0xff]  ;;  %s4250_s19 = sshll.u32 %s4823_s18, 6  ;;  %p4251_p8 = scmp.ge.s32.totalorder %s4823_s18, 2 }
  0x26   : > { %v5017_v8 = vld [vmem:[%s543_s0] sm:$0xff]  ;;  %v5019_v9 = vld [vmem:[%s543_s0 + $0x8] sm:$0xff]  ;;  %v5021_v10 = vld [vmem:[%s543_s0 + $0x10] sm:$0xff]  ;;  %s554_s27 = scalar_lea.vmem %s5633_s7, %s4250_s19  ;;  %v4619_v24 = vpack.c.bf16 (!%p4251_p8), %v5010_v5, %v5002_v4  ;;  %v4841_v25 = vmov (!%p4251_p8), 0.0|0.0   ;;  %v4622_v26 = vpack.c.bf16 (!%p4251_p8), %v5014_v7, %v5012_v6  ;;  %vm4842_vm2 = vmmov (!%p4251_p8), 0   ;;  %s4845_s1 = smov (!%p4251_p8), 96  }
  0x27   : > { %v5026_v11 = vld [vmem:[%s543_s0 + $0x18] sm:$0xff]  ;;  %v5028_v12 = vld [vmem:[%s548_s20] sm:$0xff]  ;;  %v5030_v13 = vld [vmem:[%s548_s20 + $0x8] sm:$0xff]  ;;  %566 = sbr.rel (%p4251_p8) target bundleno = 2677 (0xa75), region = 92  ;;  %4618 = vmatprep.subr.bf16.mxu1 (!%p4251_p8), %v4841_v25  ;;  %v4843_v27 = vmov (!%p4251_p8), 0.0   ;;  %vm573_vm3 = vcmask (!%p4251_p8), 261120   ;;  %v569_v29 = vlaneseq (!%p4251_p8) }
  0x28   : > { %v5032_v14 = vld [vmem:[%s548_s20 + $0x10] sm:$0xff]  ;;  %v5034_v15 = vld [vmem:[%s548_s20 + $0x18] sm:$0xff]  ;;  %v5036_v16 = vld [vmem:[%s554_s27] sm:$0xff]  ;;  %4620 = vmatpush3.bf16.msra.mxu1 (!%p4251_p8), %v4619_v24  ;;  %4418 = vmatprep.mubr.msk.f32.mxu1 (!%p4251_p8), %vm4842_vm2, %v4843_v27  ;;  %s4844_s0 = smov (!%p4251_p8), 112   ;;  %v4846_v38 = vmov (!%p4251_p8), 1983009808  }
  0x29   : > { %v5038_v17 = vld [vmem:[%s554_s27 + $0x8] sm:$0xff]  ;;  %v5040_v18 = vld [vmem:[%s554_s27 + $0x10] sm:$0xff]  ;;  %v5042_v19 = vld [vmem:[%s554_s27 + $0x18] sm:$0xff]  ;;  %4621 = vmatprep.subr.bf16.mxu1 (!%p4251_p8), %v4841_v25  ;;  %4431 = vmatprep.subr.mxu0 (!%p4251_p8), %v4843_v27  ;;  %v5071_v30 = vshrl.u32 (!%p4251_p8), %v569_v29, 7  ;;  %v654_v39 = vunpack.c.l.s4 (!%p4251_p8), %v4846_v38  ;;  %v4847_v40 = vmov (!%p4251_p8), 1934713408  }
  0x2a   : > { %v5044_v20 = vld [vmem:[%s554_s27 + $0x20] sm:$0xff]  ;;  %v5046_v21 = vld [vmem:[%s554_s27 + $0x28] sm:$0xff]  ;;  %v5048_v22 = vld [vmem:[%s554_s27 + $0x30] sm:$0xff]  ;;  %4433 = vmatprep.mubr.msk.f32.mxu0 (!%p4251_p8), %vm4842_vm2, %v4843_v27  ;;  %v685_v41 = vunpack.c.l.s4 (!%p4251_p8), %v4847_v40  ;;  %vm1015_vm4 = vcmask (!%p4251_p8), 130048   ;;  %vm1168_vm5 = vcmask (!%p4251_p8), 64512   ;;  %s4848_s23 = smov (!%p4251_p8), 64  }
  0x2b   : > { %v5050_v23 = vld [vmem:[%s554_s27 + $0x38] sm:$0xff]  ;;  %v5064_v28 = vld [vmem:[#allocation2] sm:$0xff] (!%p4251_p8)  ;;  %v571_v31 = vsub.s32 (!%p4251_p8), 0, %v5071_v30  ;;  %v655_v42 = vunpack.c.0.s8 (!%p4251_p8), %v654_v39  ;;  %s4849_s29 = smov (!%p4251_p8), 16   ;;  %vm1642_vm6 = vcmask (!%p4251_p8), 523264  }
  0x2c   : > { %4623 = vmatpush3.bf16.msra.mxu1 (!%p4251_p8), %v4622_v26  ;;  %v686_v44 = vunpack.c.0.s8 (!%p4251_p8), %v685_v41 }
  0x2d   : > { %4421 = vmatprep.subr.mxu1 (!%p4251_p8), %v4843_v27  ;;  %v572_v32 = vrot.slane (!%p4251_p8), %v4998_v2, %v571_v31  ;;  %v5084_v45 = vsub.s32 (!%p4251_p8), %v655_v42, %v5071_v30 }
  0x2e   : > { %v5088_v48 = vsub.s32 %v686_v44, %v5071_v30 }
  0x2f   : > { %4419 = vmatmul.mubr.msk.f32.vlgmr.msra.gmra.mrb[0].mxu1 %vm573_vm3, %v5064_v28 }
  0x30   : > { %4423 = vmatprep.mubr.msk.f32.mxu1 %vm4842_vm2, %v4843_v27 }
 0x102   : > { %v643_v33 = vpop.f32.mrb[0].mxu1 }
 0x103   : > { %v5075_v34 = vadd.f32 %v643_v33, %v572_v32  ;;  %v4420_v35 = vpop.f32.mrb[1].mxu1 }
 0x105   : > { %769 = vrot.lane.b32.xlu0 %v5075_v34, %s4844_s0  ;;  %v647_v37 = vmul.f32 0.25, %v5075_v34 }
 0x107   : > { %v652_v56 = vcombine.high %v647_v37, %v4843_v27  ;;  %v659_v62 = vrot.slane %v647_v37, %v5084_v45 }
 0x109   : > { %771 = vrot.lane.b32.xlu0 %v5075_v34, %s4845_s1  ;;  %v666_v31 = vrot.slane %v652_v56, %v5084_v45 }
 0x177   : > { %v5079_v36 = vpop.permute.xlu0 %769 }
 0x178   : > { %773 = vrot.lane.b32.xlu1 %v5079_v36, %s4845_s1 }
 0x17b   : > { %v772_v43 = vpop.permute.xlu0 %771 }
 0x17c   : > { %649 = vrot.lane.b32.xlu1 %v647_v37, %s4844_s0  ;;  %v777_v46 = vcombine.high %v772_v43, %v4843_v27  ;;  %v784_v49 = vrot.slane %v772_v43, %v5084_v45 }
 0x17e   : > { %v791_v52 = vrot.slane %v777_v46, %v5084_v45 }
 0x1ea   : > { %v774_v47 = vpop.permute.xlu1 %773 }
 0x1eb   : > { %v792_v50 = vcombine.high %v774_v47, %v4843_v27  ;;  %v799_v51 = vrot.slane %v774_v47, %v5084_v45 }
 0x1ed   : > { %v806_v53 = vrot.slane %v792_v50, %v5084_v45  ;;  %v807_v54 = vcombine.low %v784_v49, %v799_v51  ;;  %v808_v55 = vcombine.high %v784_v49, %v799_v51 }
 0x1ee   : > { %v650_v57 = vpop.permute.xlu1 %649 }
 0x1ef   : > { %v815_v58 = vrot.slane %v807_v54, %v5088_v48  ;;  %v822_v59 = vrot.slane %v808_v55, %v5088_v48  ;;  %v823_v60 = vcombine.low %v791_v52, %v806_v53  ;;  %v824_v61 = vcombine.high %v791_v52, %v806_v53 }
 0x1f0   : > { %v667_v63 = vcombine.high %v650_v57, %v4843_v27  ;;  %v674_v0 = vrot.slane %v650_v57, %v5084_v45 }
 0x1f1   : > { %v831_v1 = vrot.slane %v823_v60, %v5088_v48  ;;  %v838_v24 = vrot.slane %v824_v61, %v5088_v48  ;;  %v843_v26 = vcombine.low %v815_v58, %v822_v59  ;;  %v4255_v29 = vcombine.high %v815_v58, %v822_v59 }
 0x1f2   : > { %v681_v32 = vrot.slane %v667_v63, %v5084_v45  ;;  %v682_v33 = vcombine.low %v659_v62, %v674_v0  ;;  %v683_v35 = vcombine.high %v659_v62, %v674_v0 }
 0x1f3   : > { %v850_v38 = vrot.slane %v843_v26, %v5084_v45  ;;  %v858_v37 = vrot.slane %v4255_v29, %v5084_v45  ;;  %v859_v39 = vcombine.low %v831_v1, %v838_v24  ;;  %v4256_v40 = vcombine.high %v831_v1, %v838_v24 }
 0x1f4   : > { %v690_v41 = vrot.slane %v682_v33, %v5088_v48  ;;  %v697_v42 = vrot.slane %v683_v35, %v5088_v48  ;;  %v698_v43 = vcombine.low %v666_v31, %v681_v32  ;;  %v699_v44 = vcombine.high %v666_v31, %v681_v32  ;;  %v568_v33 = vld [vmem:[%s5628_s2] sm:$0xff] }
 0x1f5   : > { %v866_v46 = vrot.slane %v859_v39, %v5084_v45  ;;  %v874_v47 = vrot.slane %v4256_v40, %v5084_v45  ;;  %v875_v49 = vcombine.low %v850_v38, %v858_v37 }
 0x1f6   : > { %v706_v50 = vrot.slane %v698_v43, %v5088_v48  ;;  %v713_v51 = vrot.slane %v699_v44, %v5088_v48  ;;  %v718_v52 = vcombine.low %v690_v41, %v697_v42  ;;  %v4253_v53 = vcombine.high %v690_v41, %v697_v42 }
 0x1f7   : > { %v883_v54 = vcombine.low %v866_v46, %v874_v47  ;;  %v882_v59 = vrot.slane %v875_v49, %v5088_v48 }
 0x1f8   : > { %v725_v55 = vrot.slane %v718_v52, %v5084_v45  ;;  %v733_v56 = vrot.slane %v4253_v53, %v5084_v45  ;;  %v734_v57 = vcombine.low %v706_v50, %v713_v51  ;;  %v4254_v58 = vcombine.high %v706_v50, %v713_v51 }
 0x1f9   : > { %v890_v60 = vrot.slane %v883_v54, %v5088_v48 }
 0x1fa   : > { %v741_v61 = vrot.slane %v734_v57, %v5084_v45  ;;  %v749_v62 = vrot.slane %v4254_v58, %v5084_v45  ;;  %v750_v63 = vcombine.low %v725_v55, %v733_v56 }
 0x1fb   : > { %v891_v0 = vcombine.low %v882_v59, %v890_v60  ;;  %v892_v31 = vcombine.high %v882_v59, %v890_v60 }
 0x1fc   : > { %v758_v1 = vcombine.low %v741_v61, %v749_v62  ;;  %v757_v24 = vrot.slane %v750_v63, %v5088_v48 }
 0x1fd   : > { %4422 = vmatpush3.xpose.msk.msra.mxu1 %vm1015_vm4, %v891_v0 }
 0x1fe   : > { %4426 = vmatprep.subr.mxu1 %v4843_v27  ;;  %v765_v26 = vrot.slane %v758_v1, %v5088_v48 }
 0x200   : > { %v766_v29 = vcombine.low %v757_v24, %v765_v26  ;;  %v767_v32 = vcombine.high %v757_v24, %v765_v26 }
 0x202   : > { %4424 = vmatmul.mubr.msk.f32.vlgmr.msra.gmra.mrb[2].mxu1 %vm1015_vm4, %v766_v29 }
 0x203   : > { %4427 = vmatpush3.xpose.msk.msra.mxu1 %vm1015_vm4, %v892_v31  ;;  %4428 = vmatprep.mubr.msk.f32.mxu1 %vm4842_vm2, %v4843_v27 }
 0x204   : > { %4436 = vmatprep.subr.mxu1 %v4843_v27 }
 0x206   : > { %4429 = vmatmul.mubr.msk.f32.vlgmr.msra.gmra.mrb[4].mxu1 %vm1015_vm4, %v767_v32 }
 0x207   : > { %4438 = vmatprep.mubr.msk.f32.mxu1 %vm4842_vm2, %v4843_v27 }
 0x2d5   : > { %v1088_v35 = vpop.f32.mrb[2].mxu1 }
 0x2d6   : > { %v1089_v38 = vadd.f32 %v1088_v35, %v568_v33  ;;  %v4425_v37 = vpop.f32.mrb[3].mxu1 }
 0x2d8   : > { %v1169_v39 = vsel %vm1168_vm5, %v1089_v38, -inf }
 0x2d9   : > { %1170 = vmax.xlane.f32.xlu0 %v1169_v39  ;;  %v1164_v40 = vpop.f32.mrb[4].mxu1 }
 0x2da   : > { %v1165_v41 = vadd.f32 %v1164_v40, %v568_v33  ;;  %v4430_v42 = vpop.f32.mrb[5].mxu1 }
 0x2dc   : > { %v1172_v43 = vsel %vm1168_vm5, %v1165_v41, -inf }
 0x2dd   : > { %1173 = vmax.xlane.f32.xlu1 %v1172_v43 }
 0x2ee   : > { %893 = vrot.lane.b32.xlu1 %v5075_v34, %s4848_s23 }
 0x366   : > { %v1171_v44 = vpop.xlane.xlu0 %1170 }
 0x367   : > { %v1175_v46 = vsub.f32 %v1089_v38, %v1171_v44 }
 0x369   : > { %v1177_v47 = vmul.f32 1.442695, %v1175_v46 }
 0x36a   : > { %v1174_v49 = vpop.xlane.xlu1 %1173 }
 0x36b   : > { %4763 = vpow2.f32 %v1177_v47  ;;  %v1176_v50 = vsub.f32 %v1165_v41, %v1174_v49 }
 0x36d   : > { %v1179_v51 = vmul.f32 1.442695, %v1176_v50 }
 0x36e   : > { %v894_v34 = vpop.permute.xlu1 %893 }
 0x36f   : > { %4765 = vpow2.f32 %v1179_v51  ;;  %v899_v58 = vcombine.high %v894_v34, %v4843_v27  ;;  %v906_v60 = vrot.slane %v894_v34, %v5084_v45 }
 0x371   : > { %v913_v63 = vrot.slane %v899_v58, %v5084_v45 }
 0x375   : > { %v4764_v52 = vpop.eup %4763 }
 0x376   : > { %v1181_v53 = vsel %vm1168_vm5, %v4764_v52, 0.0 }
 0x377   : > { %1182 = vadd.xlane.f32.xlu0 %v1181_v53 }
 0x379   : > { %v4766_v54 = vpop.eup %4765 }
 0x37a   : > { %v1184_v55 = vsel %vm1168_vm5, %v4766_v54, 0.0 }
 0x37b   : > { %1185 = vadd.xlane.f32.xlu0 %v1184_v55 }
 0x391   : > { %895 = vrot.lane.b32.xlu0 %v5079_v36, %s4848_s23 }
 0x404   : > { %v1183_v56 = vpop.xlane.xlu0 %1182 }
 0x405   : > { %4767 = vrcp.f32 %v1183_v56 }
 0x408   : > { %v1186_v57 = vpop.xlane.xlu0 %1185 }
 0x409   : > { %4769 = vrcp.f32 %v1186_v57 }
 0x40c   : > { %v896_v59 = vpop.permute.xlu0 %895 }
 0x40d   : > { %v914_v61 = vcombine.high %v896_v59, %v4843_v27  ;;  %v921_v62 = vrot.slane %v896_v59, %v5084_v45 }
 0x40f   : > { %v928_v0 = vrot.slane %v914_v61, %v5084_v45  ;;  %v929_v1 = vcombine.low %v906_v60, %v921_v62  ;;  %v930_v24 = vcombine.high %v906_v60, %v921_v62  ;;  %v4768_v46 = vpop.eup %4767 }
 0x410   : > { %v1188_v34 = vmul.f32 %v4768_v46, %v4764_v52  ;;  %v4628_v52 = vpack.c.bf16 %v5026_v11, %v5021_v10 }
 0x411   : > { %v937_v36 = vrot.slane %v929_v1, %v5088_v48  ;;  %v944_v26 = vrot.slane %v930_v24, %v5088_v48  ;;  %v945_v29 = vcombine.low %v913_v63, %v928_v0  ;;  %v946_v31 = vcombine.high %v913_v63, %v928_v0 }
 0x413   : > { %v953_v32 = vrot.slane %v945_v29, %v5088_v48  ;;  %v960_v33 = vrot.slane %v946_v31, %v5088_v48  ;;  %v965_v35 = vcombine.low %v937_v36, %v944_v26  ;;  %v4257_v38 = vcombine.high %v937_v36, %v944_v26  ;;  %v4770_v49 = vpop.eup %4769 }
 0x414   : > { %v1190_v56 = vmul.f32 %v4770_v49, %v4766_v54  ;;  %v4625_v54 = vpack.c.bf16 %v5019_v9, %v5017_v8 }
 0x415   : > { %v972_v37 = vrot.slane %v965_v35, %v5084_v45  ;;  %v980_v39 = vrot.slane %v4257_v38, %v5084_v45  ;;  %v981_v40 = vcombine.low %v953_v32, %v960_v33  ;;  %v4258_v41 = vcombine.high %v953_v32, %v960_v33 }
 0x417   : > { %v988_v42 = vrot.slane %v981_v40, %v5084_v45  ;;  %v996_v43 = vrot.slane %v4258_v41, %v5084_v45  ;;  %v997_v44 = vcombine.low %v972_v37, %v980_v39 }
 0x419   : > { %v1005_v47 = vcombine.low %v988_v42, %v996_v43  ;;  %v1004_v50 = vrot.slane %v997_v44, %v5088_v48 }
 0x41b   : > { %v1012_v51 = vrot.slane %v1005_v47, %v5088_v48 }
 0x41d   : > { %v1013_v53 = vcombine.low %v1004_v50, %v1012_v51  ;;  %v1014_v55 = vcombine.high %v1004_v50, %v1012_v51 }
 0x41f   : > { %4432 = vmatpush3.msra.mxu0 %v1013_v53  ;;  %4437 = vmatpush3.msra.mxu1 %v1014_v55 }
 0x420   : > { %4434 = vmatmul.mubr.msk.f32.vlgmr.msra.gmra.mrb[0].mxu0 %vm1168_vm5, %v1188_v34  ;;  %4439 = vmatmul.mubr.msk.f32.vlgmr.msra.gmra.mrb[6].mxu1 %vm1168_vm5, %v1190_v56 }
 0x421   : > { %4624 = vmatprep.subr.bf16.mxu0 %v4841_v25  ;;  %4449 = vmatprep.mubr.msk.f32.mxu0 %vm4842_vm2, %v4843_v27 }
 0x422   : > { %4630 = vmatprep.subr.bf16.mxu1 %v4841_v25  ;;  %4460 = vmatprep.mubr.msk.f32.mxu1 %vm4842_vm2, %v4843_v27 }
 0x423   : > { %4626 = vmatpush3.bf16.msra.mxu0 %v4625_v54 }
 0x424   : > { %4627 = vmatprep.subr.bf16.mxu0 %v4841_v25 }
 0x427   : > { %4629 = vmatpush3.bf16.msra.mxu0 %v4628_v52 }
 0x428   : > { %4636 = vmatprep.subr.bf16.mxu0 %v4841_v25 }
 0x4f3   : > { %v1260_v57 = vpop.f32.mrb[0].mxu0  ;;  %v1333_v58 = vpop.f32.mrb[6].mxu1 }
 0x4f4   : > { %v1337_v59 = vcombine.high %v1260_v57, %v4843_v27  ;;  %v1344_v60 = vrot.slane %v1260_v57, %v5084_v45  ;;  %v1352_v61 = vcombine.high %v1333_v58, %v4843_v27  ;;  %v1359_v62 = vrot.slane %v1333_v58, %v5084_v45  ;;  %v4435_v63 = vpop.f32.mrb[1].mxu0  ;;  %v4440_v0 = vpop.f32.mrb[7].mxu1 }
 0x4f6   : > { %v1351_v1 = vrot.slane %v1337_v59, %v5084_v45  ;;  %v1366_v24 = vrot.slane %v1352_v61, %v5084_v45  ;;  %v1367_v36 = vcombine.low %v1344_v60, %v1359_v62  ;;  %v1368_v26 = vcombine.high %v1344_v60, %v1359_v62 }
 0x4f8   : > { %v1375_v29 = vrot.slane %v1367_v36, %v5088_v48  ;;  %v1382_v31 = vrot.slane %v1368_v26, %v5088_v48  ;;  %v1383_v32 = vcombine.low %v1351_v1, %v1366_v24  ;;  %v1384_v33 = vcombine.high %v1351_v1, %v1366_v24 }
 0x4f9   : > { %v4634_v1 = vpack.c.bf16 %v5034_v15, %v5032_v14  ;;  %v4640_v24 = vpack.c.bf16 %v5042_v19, %v5040_v18  ;;  %v4643_v36 = vpack.c.bf16 %v5046_v21, %v5044_v20 }
 0x4fa   : > { %v1391_v35 = vrot.slane %v1383_v32, %v5088_v48  ;;  %v1398_v38 = vrot.slane %v1384_v33, %v5088_v48  ;;  %v1403_v37 = vcombine.low %v1375_v29, %v1382_v31  ;;  %v4265_v39 = vcombine.high %v1375_v29, %v1382_v31 }
 0x4fb   : > { %v1552_v32 = vsub.s32 3, %v5071_v30  ;;  %v1557_v33 = vsub.s32 4, %v5071_v30 }
 0x4fc   : > { %v1410_v40 = vrot.slane %v1403_v37, %v5084_v45  ;;  %v1418_v41 = vrot.slane %v4265_v39, %v5084_v45  ;;  %v1419_v42 = vcombine.low %v1391_v35, %v1398_v38  ;;  %v4266_v43 = vcombine.high %v1391_v35, %v1398_v38 }
 0x4fd   : > { %v1553_v35 = vrot.slane %v4998_v2, %v1552_v32  ;;  %v1558_v39 = vrot.slane %v4998_v2, %v1557_v33 }
 0x4fe   : > { %v1426_v44 = vrot.slane %v1419_v42, %v5084_v45  ;;  %v1434_v46 = vrot.slane %v4266_v43, %v5084_v45  ;;  %v1435_v47 = vcombine.low %v1410_v40, %v1418_v41  ;;  %v1460_v45 = vsub.s32 2, %v5071_v30 }
 0x4ff   : > { %v1562_v42 = vsub.s32 1, %v5071_v30 }
 0x500   : > { %v1443_v49 = vcombine.low %v1426_v44, %v1434_v46  ;;  %v1442_v50 = vrot.slane %v1435_v47, %v5088_v48  ;;  %v1461_v54 = vrot.slane %v4998_v2, %v1460_v45 }
 0x501   : > { %v1563_v43 = vrot.slane %v4998_v2, %v1562_v42 }
 0x502   : > { %v1450_v51 = vrot.slane %v1443_v49, %v5088_v48 }
 0x504   : > { %v1452_v53 = vcombine.high %v1442_v50, %v1450_v51  ;;  %v1451_v55 = vcombine.low %v1442_v50, %v1450_v51  ;;  %v1640_v50 = vsub.s32 5, %v5071_v30 }
 0x506   : > { %1454 = vrot.lane.b32.xlu1 %v1452_v53, %s4849_s29  ;;  %v1641_v51 = vrot.slane %v4998_v2, %v1640_v50 }
 0x578   : > { %v1455_v56 = vpop.permute.xlu1 %1454 }
 0x579   : > { %v1457_v34 = vsel %vm1015_vm4, %v1451_v55, %v1455_v56 }
 0x57a   : > { %4450 = vmatmul.mubr.msk.f32.vlgmr.msra.gmra.mrb[2].mxu0 %vm573_vm3, %v1457_v34 }
 0x57b   : > { %4479 = vmatprep.mubr.msk.f32.mxu0 %vm4842_vm2, %v4843_v27  ;;  %v4631_v27 = vpack.c.bf16 %v5030_v13, %v5028_v12 }
 0x57d   : > { %4632 = vmatpush3.bf16.msra.mxu1 %v4631_v27 }
 0x57e   : > { %4633 = vmatprep.subr.bf16.mxu1 %v4841_v25 }
 0x581   : > { %4635 = vmatpush3.bf16.msra.mxu1 %v4634_v1 }
 0x64d   : > { %v1531_v52 = vpop.f32.mrb[2].mxu0 }
 0x64e   : > { %v1532_v57 = vadd.f32 %v1531_v52, %v1461_v54  ;;  %v4451_v58 = vpop.f32.mrb[3].mxu0 }
 0x650   : > { %v1535_v48 = vadd.f32 %v1532_v57, %v5064_v28  ;;  %v4637_v28 = vpack.c.bf16 %v5038_v17, %v5036_v16 }
 0x652   : > { %v1536_v59 = vsel %vm573_vm3, %v1535_v48, 0.0  ;;  %4638 = vmatpush3.bf16.msra.mxu0 %v4637_v28 }
 0x653   : > { %1537 = vadd.xlane.f32.xlu1 %v1536_v59  ;;  %4639 = vmatprep.subr.bf16.mxu0 %v4841_v25 }
 0x656   : > { %4641 = vmatpush3.bf16.msra.mxu0 %v4640_v24 }
 0x657   : > { %4642 = vmatprep.subr.bf16.mxu0 %v4841_v25 }
 0x65a   : > { %4644 = vmatpush3.bf16.msra.mxu0 %v4643_v36 }
 0x65b   : > { %4645 = vmatprep.subr.bf16.mxu0 %v4841_v25  ;;  %v4646_v25 = vpack.c.bf16 %v5050_v23, %v5048_v22 }
 0x65e   : > { %4647 = vmatpush3.bf16.msra.mxu0 %v4646_v25 }
 0x6e0   : > { %v1538_v60 = vpop.xlane.xlu1 %1537 }
 0x6e1   : > { %v1540_v61 = vmul.f32 0.03125, %v1538_v60 }
 0x6e3   : > { %v1541_v62 = vsub.f32 %v1535_v48, %v1540_v61 }
 0x6e5   : > { %v1542_v63 = vmul.f32 %v1541_v62, %v1541_v62 }
 0x6e7   : > { %v1543_v0 = vsel %vm573_vm3, %v1542_v63, 0.0  ;;  %v1737_v63 = vsub.s32 7, %v5071_v30 }
 0x6e8   : > { %1544 = vadd.xlane.f32.xlu0 %v1543_v0 }
 0x6e9   : > { %v1738_v1 = vrot.slane %v4998_v2, %v1737_v63 }
 0x775   : > { %v1545_v26 = vpop.xlane.xlu0 %1544 }
 0x776   : > { %v1546_v29 = vmul.f32 0.03125, %v1545_v26 }
 0x778   : > { %v1547_v31 = vadd.f32 1e-05, %v1546_v29 }
 0x77a   : > { %4771 = vrsqrt.f32 %v1547_v31 }
 0x784   : > { %v4772_v38 = vpop.eup %4771 }
 0x785   : > { %v1549_v37 = vmul.f32 %v4772_v38, %v1541_v62  ;;  %v1732_v62 = vsub.s32 6, %v5071_v30 }
 0x787   : > { %v1554_v40 = vmul.f32 %v1553_v35, %v1549_v37  ;;  %v1733_v0 = vrot.slane %v4998_v2, %v1732_v62 }
 0x789   : > { %v1559_v41 = vadd.f32 %v1558_v39, %v1554_v40 }
 0x78b   : > { %4461 = vmatmul.mubr.msk.f32.vlgmr.msra.gmra.mrb[8].mxu1 %vm573_vm3, %v1559_v41 }
 0x85e   : > { %v1633_v44 = vpop.f32.mrb[8].mxu1 }
 0x85f   : > { %v1634_v46 = vadd.f32 %v1633_v44, %v1563_v43  ;;  %v4462_v47 = vpop.f32.mrb[9].mxu1 }
 0x861   : > { %v1637_v49 = vmax.f32 %v1634_v46, 0.0 }
 0x863   : > { %4480 = vmatmul.mubr.msk.f32.vlgmr.msra.gmra.mrb[4].mxu0 %vm1642_vm6, %v1637_v49 }
 0x936   : > { %v1712_v53 = vpop.f32.mrb[4].mxu0 }
 0x937   : > { %v1713_v55 = vadd.f32 %v1712_v53, %v1641_v51  ;;  %v4481_v56 = vpop.f32.mrb[5].mxu0 }
 0x939   : > { %v1716_v34 = vadd.f32 %v1713_v55, %v1559_v41 }
 0x93b   : > { %v1717_v45 = vsel %vm573_vm3, %v1716_v34, 0.0 }
 0x93c   : > { %1718 = vadd.xlane.f32.xlu0 %v1717_v45 }
 0x9c9   : > { %v1719_v54 = vpop.xlane.xlu0 %1718 }
 0x9ca   : > { %v1720_v52 = vmul.f32 0.03125, %v1719_v54 }
 0x9cc   : > { %v1721_v57 = vsub.f32 %v1716_v34, %v1720_v52 }
 0x9ce   : > { %v1722_v58 = vmul.f32 %v1721_v57, %v1721_v57 }
 0x9d0   : > { %v1723_v48 = vsel %vm573_vm3, %v1722_v58, 0.0 }
 0x9d1   : > { %1724 = vadd.xlane.f32.xlu1 %v1723_v48 }
 0xa5e   : > { %v1725_v59 = vpop.xlane.xlu1 %1724 }
 0xa5f   : > { %v1726_v60 = vmul.f32 0.03125, %v1725_v59 }
 0xa61   : > { %v1727_v61 = vadd.f32 1e-05, %v1726_v60 }
 0xa63   : > { %4773 = vrsqrt.f32 %v1727_v61 }
 0xa6d   : > { %v4774_v27 = vpop.eup %4773 }
 0xa6e   : > { %v1729_v28 = vmul.f32 %v4774_v27, %v1721_v57 }
 0xa70   : > { %v1734_v24 = vmul.f32 %v1733_v0, %v1729_v28 }
 0xa72   : > { %v1739_v36 = vadd.f32 %v1738_v1, %v1734_v24 }
 0xa74   : > { %1740 = vst.msk [vmem:[#allocation2] sm:$0xff] %vm573_vm3, %v1739_v36 }
 0xa75 PF: > { %p4270_p9 = scmp.ne.s32.totalorder %s4823_s18, 1 }
 0xa76   : > { %vm1748_vm7 = vcmask (!%p4270_p9), 261120   ;;  %v4271_v41 = vld [vmem:[%s5638_s12] ss:$0 sm:$0xff] (!%p4270_p9)  ;;  %v4272_v42 = vld [vmem:[%s5638_s12 + $0x1] ss:$0 sm:$0xff] (!%p4270_p9) }
 0xa77   : > { %1744 = sbr.rel (%p4270_p9) target bundleno = 2998 (0xbb6), region = 96 }
 0xa7b   : > { %v1745_v26 = vld [vmem:[#allocation2] sm:$0xff] (!%p4270_p9) }
 0xa7c   : > { %v1749_v29 = vsel (!%p4270_p9), %vm1748_vm7, %v1745_v26, 0.0 }
 0xa7d   : > { %1750 = vadd.xlane.f32.xlu0 (!%p4270_p9), %v1749_v29 }
 0xb0a   : > { %v1751_v30 = vpop.xlane.xlu0 %1750 }
 0xb0b   : > { %v1753_v31 = vmul.f32 0.03125, %v1751_v30 }
 0xb0d   : > { %v1754_v32 = vsub.f32 %v1745_v26, %v1753_v31 }
 0xb0f   : > { %v1755_v33 = vmul.f32 %v1754_v32, %v1754_v32 }
 0xb11   : > { %v1756_v35 = vsel %vm1748_vm7, %v1755_v33, 0.0 }
 0xb12   : > { %1757 = vadd.xlane.f32.xlu0 %v1756_v35 }
 0xb9f   : > { %v1758_v38 = vpop.xlane.xlu0 %1757 }
 0xba0   : > { %v1759_v37 = vmul.f32 0.03125, %v1758_v38 }
 0xba2   : > { %v1760_v39 = vadd.f32 1e-05, %v1759_v37 }
 0xba4   : > { %4775 = vrsqrt.f32 %v1760_v39 }
 0xbae   : > { %v4776_v40 = vpop.eup %4775 }
 0xbaf   : > { %v1762_v25 = vmul.f32 %v4776_v40, %v1754_v32 }
 0xbb1   : > { %v1767_v43 = vmul.f32 %v4271_v41, %v1762_v25 }
 0xbb3   : > { %v1772_v44 = vadd.f32 %v4272_v42, %v1767_v43 }
 0xbb5   : > { %1773 = vst.msk [vmem:[#allocation2] sm:$0xff] %vm1748_vm7, %v1772_v44 }
 0xbb6 PF: > { %p4273_p10 = scmp.lt.s32.totalorder %s4823_s18, 2 }
 0xbb7   : > { %v4649_v46 = vpack.c.bf16 (!%p4273_p10), %v5010_v5, %v5002_v4  ;;  %v4850_v47 = vmov (!%p4273_p10), 0.0|0.0   ;;  %v4652_v49 = vpack.c.bf16 (!%p4273_p10), %v5014_v7, %v5012_v6  ;;  %vm4851_vm8 = vmmov (!%p4273_p10), 0   ;;  %v5249_v4 = vld [vmem:[#allocation3] sm:$0xff] (!%p4273_p10)  ;;  %s4853_s19 = smov (!%p4273_p10), 112   ;;  %s4854_s26 = smov (!%p4273_p10), 96  }
 0xbb8   : > { %1777 = sbr.rel (%p4273_p10) target bundleno = 7402 (0x1cea), region = 100  ;;  %4648 = vmatprep.subr.bf16.mxu1 (!%p4273_p10), %v4850_v47  ;;  %v4852_v50 = vmov (!%p4273_p10), 0.0   ;;  %vm1785_vm9 = vcmask (!%p4273_p10), 261120   ;;  %v1781_v5 = vlaneseq (!%p4273_p10)  ;;  %v4855_v54 = vmov (!%p4273_p10), 1983009808   ;;  %s4857_s0 = smov (!%p4273_p10), 64  }
 0xbb9   : > { %4650 = vmatpush3.bf16.msra.mxu1 (!%p4273_p10), %v4649_v46  ;;  %4490 = vmatprep.mubr.msk.f32.mxu1 (!%p4273_p10), %vm4851_vm8, %v4852_v50  ;;  %v1866_v52 = vunpack.c.l.s4 (!%p4273_p10), %v4855_v54  ;;  %v4856_v57 = vmov (!%p4273_p10), 1934713408   ;;  %vm2227_vm10 = vcmask (!%p4273_p10), 130048   ;;  %vm2380_vm11 = vcmask (!%p4273_p10), 64512   ;;  %s4858_s1 = smov (!%p4273_p10), 16   ;;  %s4274_s20 = sadd.s32 (!%p4273_p10), 4294967294, %s4823_s18 }
 0xbba   : > { %4651 = vmatprep.subr.bf16.mxu1 (!%p4273_p10), %v4850_v47  ;;  %4503 = vmatprep.subr.mxu0 (!%p4273_p10), %v4852_v50  ;;  %v5256_v6 = vshrl.u32 (!%p4273_p10), %v1781_v5, 7  ;;  %v1897_v58 = vunpack.c.l.s4 (!%p4273_p10), %v4856_v57  ;;  %s5389_s21 = sshll.u32 (!%p4273_p10), %s4274_s20, 5  ;;  %vm3930_vm12 = vcmask (!%p4273_p10), 523264  }
 0xbbb   : > { %4505 = vmatprep.mubr.msk.f32.mxu0 (!%p4273_p10), %vm4851_vm8, %v4852_v50  ;;  %v1867_v48 = vunpack.c.0.s8 (!%p4273_p10), %v1866_v52  ;;  %s2856_s28 = scalar_lea.vmem (!%p4273_p10), %s5635_s9, %s5389_s21  ;;  %s2774_s16 = scalar_lea.vmem (!%p4273_p10), %s5634_s8, %s5389_s21 }
 0xbbc   : > { %v1783_v7 = vsub.s32 (!%p4273_p10), 0, %v5256_v6  ;;  %v1898_v60 = vunpack.c.0.s8 (!%p4273_p10), %v1897_v58  ;;  %s3742_s24 = scalar_lea.vmem (!%p4273_p10), %s5636_s10, %s5389_s21 }
 0xbbd   : > { %4653 = vmatpush3.bf16.msra.mxu1 (!%p4273_p10), %v4652_v49  ;;  %v5275_v61 = vsub.s32 (!%p4273_p10), %v1867_v48, %v5256_v6 }
 0xbbe   : > { %4493 = vmatprep.subr.mxu1 (!%p4273_p10), %v4852_v50  ;;  %v1784_v51 = vrot.slane (!%p4273_p10), %v4998_v2, %v1783_v7  ;;  %v5279_v0 = vsub.s32 (!%p4273_p10), %v1898_v60, %v5256_v6 }
 0xbc0   : > { %4491 = vmatmul.mubr.msk.f32.vlgmr.msra.gmra.mrb[0].mxu1 %vm1785_vm9, %v5249_v4 }
 0xbc1   : > { %4495 = vmatprep.mubr.msk.f32.mxu1 %vm4851_vm8, %v4852_v50 }
 0xc93   : > { %v1855_v53 = vpop.f32.mrb[0].mxu1 }
 0xc94   : > { %v5262_v55 = vadd.f32 %v1855_v53, %v1784_v51  ;;  %v4492_v56 = vpop.f32.mrb[1].mxu1 }
 0xc96   : > { %1981 = vrot.lane.b32.xlu0 %v5262_v55, %s4853_s19  ;;  %v1859_v45 = vmul.f32 0.25, %v5262_v55 }
 0xc98   : > { %v1864_v30 = vcombine.high %v1859_v45, %v4852_v50  ;;  %v1871_v37 = vrot.slane %v1859_v45, %v5275_v61 }
 0xc9a   : > { %1983 = vrot.lane.b32.xlu0 %v5262_v55, %s4854_s26  ;;  %v1878_v44 = vrot.slane %v1864_v30, %v5275_v61 }
 0xd08   : > { %v5268_v34 = vpop.permute.xlu0 %1981 }
 0xd09   : > { %1985 = vrot.lane.b32.xlu1 %v5268_v34, %s4854_s26 }
 0xd0c   : > { %v1984_v59 = vpop.permute.xlu0 %1983 }
 0xd0d   : > { %1861 = vrot.lane.b32.xlu1 %v1859_v45, %s4853_s19  ;;  %v1989_v62 = vcombine.high %v1984_v59, %v4852_v50  ;;  %v1996_v27 = vrot.slane %v1984_v59, %v5275_v61 }
 0xd0f   : > { %v2003_v24 = vrot.slane %v1989_v62, %v5275_v61 }
 0xd7b   : > { %v1986_v63 = vpop.permute.xlu1 %1985 }
 0xd7c   : > { %v2004_v1 = vcombine.high %v1986_v63, %v4852_v50  ;;  %v2011_v28 = vrot.slane %v1986_v63, %v5275_v61 }
 0xd7e   : > { %v2018_v36 = vrot.slane %v2004_v1, %v5275_v61  ;;  %v2019_v26 = vcombine.low %v1996_v27, %v2011_v28  ;;  %v2020_v29 = vcombine.high %v1996_v27, %v2011_v28 }
 0xd7f   : > { %v1862_v31 = vpop.permute.xlu1 %1861 }
 0xd80   : > { %v2027_v32 = vrot.slane %v2019_v26, %v5279_v0  ;;  %v2034_v33 = vrot.slane %v2020_v29, %v5279_v0  ;;  %v2035_v35 = vcombine.low %v2003_v24, %v2018_v36  ;;  %v2036_v38 = vcombine.high %v2003_v24, %v2018_v36 }
 0xd81   : > { %v1879_v39 = vcombine.high %v1862_v31, %v4852_v50  ;;  %v1886_v40 = vrot.slane %v1862_v31, %v5275_v61 }
 0xd82   : > { %v2043_v41 = vrot.slane %v2035_v35, %v5279_v0  ;;  %v2050_v25 = vrot.slane %v2036_v38, %v5279_v0  ;;  %v2055_v42 = vcombine.low %v2027_v32, %v2034_v33  ;;  %v4278_v43 = vcombine.high %v2027_v32, %v2034_v33 }
 0xd83   : > { %v1893_v46 = vrot.slane %v1879_v39, %v5275_v61  ;;  %v1894_v49 = vcombine.low %v1871_v37, %v1886_v40  ;;  %v1895_v5 = vcombine.high %v1871_v37, %v1886_v40 }
 0xd84   : > { %v2062_v51 = vrot.slane %v2055_v42, %v5275_v61  ;;  %v2070_v53 = vrot.slane %v4278_v43, %v5275_v61  ;;  %v2071_v56 = vcombine.low %v2043_v41, %v2050_v25  ;;  %v4279_v45 = vcombine.high %v2043_v41, %v2050_v25  ;;  %v1780_v43 = vld [vmem:[%s5629_s3] sm:$0xff] }
 0xd85   : > { %v1902_v54 = vrot.slane %v1894_v49, %v5279_v0  ;;  %v1909_v52 = vrot.slane %v1895_v5, %v5279_v0  ;;  %v1910_v57 = vcombine.low %v1878_v44, %v1893_v46  ;;  %v1911_v58 = vcombine.high %v1878_v44, %v1893_v46 }
 0xd86   : > { %v2078_v48 = vrot.slane %v2071_v56, %v5275_v61  ;;  %v2086_v59 = vrot.slane %v4279_v45, %v5275_v61  ;;  %v2087_v60 = vcombine.low %v2062_v51, %v2070_v53 }
 0xd87   : > { %v1918_v62 = vrot.slane %v1910_v57, %v5279_v0  ;;  %v1925_v63 = vrot.slane %v1911_v58, %v5279_v0  ;;  %v1930_v27 = vcombine.low %v1902_v54, %v1909_v52  ;;  %v4276_v1 = vcombine.high %v1902_v54, %v1909_v52 }
 0xd88   : > { %v2095_v28 = vcombine.low %v2078_v48, %v2086_v59  ;;  %v2094_v30 = vrot.slane %v2087_v60, %v5279_v0 }
 0xd89   : > { %v1937_v24 = vrot.slane %v1930_v27, %v5275_v61  ;;  %v1945_v36 = vrot.slane %v4276_v1, %v5275_v61  ;;  %v1946_v26 = vcombine.low %v1918_v62, %v1925_v63  ;;  %v4277_v29 = vcombine.high %v1918_v62, %v1925_v63 }
 0xd8a   : > { %v2102_v31 = vrot.slane %v2095_v28, %v5279_v0 }
 0xd8b   : > { %v1953_v32 = vrot.slane %v1946_v26, %v5275_v61  ;;  %v1961_v33 = vrot.slane %v4277_v29, %v5275_v61  ;;  %v1962_v35 = vcombine.low %v1937_v24, %v1945_v36 }
 0xd8c   : > { %v2103_v38 = vcombine.low %v2094_v30, %v2102_v31  ;;  %v2104_v25 = vcombine.high %v2094_v30, %v2102_v31 }
 0xd8d   : > { %v1970_v37 = vcombine.low %v1953_v32, %v1961_v33  ;;  %v1969_v39 = vrot.slane %v1962_v35, %v5279_v0 }
 0xd8e   : > { %4494 = vmatpush3.xpose.msk.msra.mxu1 %vm2227_vm10, %v2103_v38 }
 0xd8f   : > { %4498 = vmatprep.subr.mxu1 %v4852_v50  ;;  %v1977_v40 = vrot.slane %v1970_v37, %v5279_v0 }
 0xd91   : > { %v1978_v41 = vcombine.low %v1969_v39, %v1977_v40  ;;  %v1979_v42 = vcombine.high %v1969_v39, %v1977_v40 }
 0xd93   : > { %4496 = vmatmul.mubr.msk.f32.vlgmr.msra.gmra.mrb[2].mxu1 %vm2227_vm10, %v1978_v41 }
 0xd94   : > { %4499 = vmatpush3.xpose.msk.msra.mxu1 %vm2227_vm10, %v2104_v25  ;;  %4500 = vmatprep.mubr.msk.f32.mxu1 %vm4851_vm8, %v4852_v50 }
 0xd95   : > { %4508 = vmatprep.subr.mxu1 %v4852_v50 }
 0xd97   : > { %4501 = vmatmul.mubr.msk.f32.vlgmr.msra.gmra.mrb[4].mxu1 %vm2227_vm10, %v1979_v42 }
 0xd98   : > { %4510 = vmatprep.mubr.msk.f32.mxu1 %vm4851_vm8, %v4852_v50 }
 0xe66   : > { %v2300_v44 = vpop.f32.mrb[2].mxu1 }
 0xe67   : > { %v2301_v46 = vadd.f32 %v2300_v44, %v1780_v43  ;;  %v4497_v49 = vpop.f32.mrb[3].mxu1 }
 0xe69   : > { %v2381_v5 = vsel %vm2380_vm11, %v2301_v46, -inf }
 0xe6a   : > { %2382 = vmax.xlane.f32.xlu0 %v2381_v5  ;;  %v2376_v51 = vpop.f32.mrb[4].mxu1 }
 0xe6b   : > { %v2377_v53 = vadd.f32 %v2376_v51, %v1780_v43  ;;  %v4502_v56 = vpop.f32.mrb[5].mxu1 }
 0xe6d   : > { %v2384_v45 = vsel %vm2380_vm11, %v2377_v53, -inf }
 0xe6e   : > { %2385 = vmax.xlane.f32.xlu1 %v2384_v45 }
 0xe7f   : > { %2105 = vrot.lane.b32.xlu1 %v5262_v55, %s4857_s0 }
 0xef7   : > { %v2383_v54 = vpop.xlane.xlu0 %2382 }
 0xef8   : > { %v2387_v52 = vsub.f32 %v2301_v46, %v2383_v54 }
 0xefa   : > { %v2389_v57 = vmul.f32 1.442695, %v2387_v52 }
 0xefb   : > { %v2386_v58 = vpop.xlane.xlu1 %2385 }
 0xefc   : > { %4777 = vpow2.f32 %v2389_v57  ;;  %v2388_v48 = vsub.f32 %v2377_v53, %v2386_v58 }
 0xefe   : > { %v2391_v59 = vmul.f32 1.442695, %v2388_v48 }
 0xeff   : > { %v2106_v55 = vpop.permute.xlu1 %2105 }
 0xf00   : > { %4779 = vpow2.f32 %v2391_v59  ;;  %v2111_v24 = vcombine.high %v2106_v55, %v4852_v50  ;;  %v2118_v26 = vrot.slane %v2106_v55, %v5275_v61 }
 0xf02   : > { %v2125_v31 = vrot.slane %v2111_v24, %v5275_v61 }
 0xf06   : > { %v4778_v60 = vpop.eup %4777 }
 0xf07   : > { %v2393_v62 = vsel %vm2380_vm11, %v4778_v60, 0.0 }
 0xf08   : > { %2394 = vadd.xlane.f32.xlu0 %v2393_v62 }
 0xf0a   : > { %v4780_v63 = vpop.eup %4779 }
 0xf0b   : > { %v2396_v27 = vsel %vm2380_vm11, %v4780_v63, 0.0 }
 0xf0c   : > { %2397 = vadd.xlane.f32.xlu0 %v2396_v27 }
 0xf22   : > { %2107 = vrot.lane.b32.xlu0 %v5268_v34, %s4857_s0 }
 0xf95   : > { %v2395_v1 = vpop.xlane.xlu0 %2394 }
 0xf96   : > { %4781 = vrcp.f32 %v2395_v1 }
 0xf99   : > { %v2398_v28 = vpop.xlane.xlu0 %2397 }
 0xf9a   : > { %4783 = vrcp.f32 %v2398_v28 }
 0xf9d   : > { %v2108_v36 = vpop.permute.xlu0 %2107 }
 0xf9e   : > { %v2126_v29 = vcombine.high %v2108_v36, %v4852_v50  ;;  %v2133_v30 = vrot.slane %v2108_v36, %v5275_v61 }
 0xfa0   : > { %v2140_v32 = vrot.slane %v2126_v29, %v5275_v61  ;;  %v2141_v33 = vcombine.low %v2118_v26, %v2133_v30  ;;  %v2142_v35 = vcombine.high %v2118_v26, %v2133_v30  ;;  %v4782_v56 = vpop.eup %4781 }
 0xfa1   : > { %v2400_v62 = vmul.f32 %v4782_v56, %v4778_v60  ;;  %v4658_v60 = vpack.c.bf16 %v5026_v11, %v5021_v10 }
 0xfa2   : > { %v2149_v34 = vrot.slane %v2141_v33, %v5279_v0  ;;  %v2156_v38 = vrot.slane %v2142_v35, %v5279_v0  ;;  %v2157_v37 = vcombine.low %v2125_v31, %v2140_v32  ;;  %v2158_v39 = vcombine.high %v2125_v31, %v2140_v32 }
 0xfa4   : > { %v2165_v40 = vrot.slane %v2157_v37, %v5279_v0  ;;  %v2172_v41 = vrot.slane %v2158_v39, %v5279_v0  ;;  %v2177_v25 = vcombine.low %v2149_v34, %v2156_v38  ;;  %v4280_v42 = vcombine.high %v2149_v34, %v2156_v38  ;;  %v4784_v54 = vpop.eup %4783 }
 0xfa5   : > { %v2402_v59 = vmul.f32 %v4784_v54, %v4780_v63  ;;  %v4655_v63 = vpack.c.bf16 %v5019_v9, %v5017_v8  ;;  %v2672_v54 = vsub.s32 2, %v5256_v6 }
 0xfa6   : > { %v2184_v43 = vrot.slane %v2177_v25, %v5275_v61  ;;  %v2192_v44 = vrot.slane %v4280_v42, %v5275_v61  ;;  %v2193_v46 = vcombine.low %v2165_v40, %v2172_v41  ;;  %v4281_v49 = vcombine.high %v2165_v40, %v2172_v41 }
 0xfa8   : > { %v2200_v5 = vrot.slane %v2193_v46, %v5275_v61  ;;  %v2208_v51 = vrot.slane %v4281_v49, %v5275_v61  ;;  %v2209_v53 = vcombine.low %v2184_v43, %v2192_v44 }
 0xfaa   : > { %v2217_v45 = vcombine.low %v2200_v5, %v2208_v51  ;;  %v2216_v52 = vrot.slane %v2209_v53, %v5279_v0 }
 0xfac   : > { %v2224_v57 = vrot.slane %v2217_v45, %v5279_v0 }
 0xfae   : > { %v2225_v58 = vcombine.low %v2216_v52, %v2224_v57  ;;  %v2226_v48 = vcombine.high %v2216_v52, %v2224_v57  ;;  %v2673_v52 = vrot.slane %v4998_v2, %v2672_v54 }
 0xfb0   : > { %4504 = vmatpush3.msra.mxu0 %v2225_v58  ;;  %4509 = vmatpush3.msra.mxu1 %v2226_v48 }
 0xfb1   : > { %4506 = vmatmul.mubr.msk.f32.vlgmr.msra.gmra.mrb[0].mxu0 %vm2380_vm11, %v2400_v62  ;;  %4511 = vmatmul.mubr.msk.f32.vlgmr.msra.gmra.mrb[6].mxu1 %vm2380_vm11, %v2402_v59 }
 0xfb2   : > { %4654 = vmatprep.subr.bf16.mxu0 %v4850_v47  ;;  %4521 = vmatprep.mubr.msk.f32.mxu0 %vm4851_vm8, %v4852_v50 }
 0xfb3   : > { %4660 = vmatprep.subr.bf16.mxu1 %v4850_v47  ;;  %4532 = vmatprep.mubr.msk.f32.mxu1 %vm4851_vm8, %v4852_v50 }
 0xfb4   : > { %4656 = vmatpush3.bf16.msra.mxu0 %v4655_v63  ;;  %v2857_v63 = vld [vmem:[%s2856_s28] sm:$0xff] }
 0xfb5   : > { %4657 = vmatprep.subr.bf16.mxu0 %v4850_v47 }
 0xfb8   : > { %4659 = vmatpush3.bf16.msra.mxu0 %v4658_v60  ;;  %v2858_v60 = vld [vmem:[%s2856_s28 + $0x8] sm:$0xff] }
 0xfb9   : > { %4666 = vmatprep.subr.bf16.mxu0 %v4850_v47 }
0x1084   : > { %v2472_v27 = vpop.f32.mrb[0].mxu0  ;;  %v2545_v1 = vpop.f32.mrb[6].mxu1 }
0x1085   : > { %v2549_v55 = vcombine.high %v2472_v27, %v4852_v50  ;;  %v2556_v28 = vrot.slane %v2472_v27, %v5275_v61  ;;  %v2564_v24 = vcombine.high %v2545_v1, %v4852_v50  ;;  %v2571_v36 = vrot.slane %v2545_v1, %v5275_v61  ;;  %v4507_v8 = vpop.f32.mrb[1].mxu0  ;;  %v4512_v9 = vpop.f32.mrb[7].mxu1  ;;  %v2859_v27 = vld [vmem:[%s2856_s28 + $0x10] sm:$0xff] }
0x1086   : > { %v4667_v1 = vpack.c.bf16 %v2858_v60, %v2857_v63 }
0x1087   : > { %v2563_v26 = vrot.slane %v2549_v55, %v5275_v61  ;;  %v2578_v10 = vrot.slane %v2564_v24, %v5275_v61  ;;  %v2579_v11 = vcombine.low %v2556_v28, %v2571_v36  ;;  %v2580_v29 = vcombine.high %v2556_v28, %v2571_v36  ;;  %v2860_v55 = vld [vmem:[%s2856_s28 + $0x18] sm:$0xff] }
0x1088   : > { %v4670_v28 = vpack.c.bf16 %v2860_v55, %v2859_v27 }
0x1089   : > { %v2587_v30 = vrot.slane %v2579_v11, %v5279_v0  ;;  %v2594_v31 = vrot.slane %v2580_v29, %v5279_v0  ;;  %v2595_v32 = vcombine.low %v2563_v26, %v2578_v10  ;;  %v2596_v33 = vcombine.high %v2563_v26, %v2578_v10  ;;  %v2775_v10 = vld [vmem:[%s2774_s16] sm:$0xff]  ;;  %v2776_v11 = vld [vmem:[%s2774_s16 + $0x8] sm:$0xff] }
0x108a   : > { %v4661_v29 = vpack.c.bf16 %v2776_v11, %v2775_v10 }
0x108b   : > { %v2603_v35 = vrot.slane %v2595_v32, %v5279_v0  ;;  %v2610_v34 = vrot.slane %v2596_v33, %v5279_v0  ;;  %v2615_v38 = vcombine.low %v2587_v30, %v2594_v31  ;;  %v4288_v37 = vcombine.high %v2587_v30, %v2594_v31  ;;  %v2777_v30 = vld [vmem:[%s2774_s16 + $0x10] sm:$0xff]  ;;  %v2778_v31 = vld [vmem:[%s2774_s16 + $0x18] sm:$0xff] }
0x108c   : > { %4662 = vmatpush3.bf16.msra.mxu1 %v4661_v29  ;;  %v4664_v32 = vpack.c.bf16 %v2778_v31, %v2777_v30  ;;  %v2863_v33 = vsub.s32 1, %v5256_v6 }
0x108d   : > { %v2622_v39 = vrot.slane %v2615_v38, %v5275_v61  ;;  %v2630_v40 = vrot.slane %v4288_v37, %v5275_v61  ;;  %v2631_v41 = vcombine.low %v2603_v35, %v2610_v34  ;;  %v4289_v25 = vcombine.high %v2603_v35, %v2610_v34  ;;  %4663 = vmatprep.subr.bf16.mxu1 %v4850_v47 }
0x108e   : > { %v2864_v35 = vrot.slane %v5000_v3, %v2863_v33 }
0x108f   : > { %v2638_v42 = vrot.slane %v2631_v41, %v5275_v61  ;;  %v2646_v43 = vrot.slane %v4289_v25, %v5275_v61  ;;  %v2647_v44 = vcombine.low %v2622_v39, %v2630_v40  ;;  %v2764_v25 = vsub.s32 3, %v5256_v6 }
0x1090   : > { %4665 = vmatpush3.bf16.msra.mxu1 %v4664_v32 }
0x1091   : > { %v2655_v46 = vcombine.low %v2638_v42, %v2646_v43  ;;  %v2654_v49 = vrot.slane %v2647_v44, %v5279_v0  ;;  %4546 = vmatprep.subr.mxu1 %v4852_v50  ;;  %v2769_v42 = vsub.s32 4, %v5256_v6  ;;  %v2765_v43 = vrot.slane %v4998_v2, %v2764_v25 }
0x1093   : > { %v2662_v5 = vrot.slane %v2655_v46, %v5279_v0 }
0x1095   : > { %v2664_v51 = vcombine.high %v2654_v49, %v2662_v5  ;;  %v2663_v53 = vcombine.low %v2654_v49, %v2662_v5  ;;  %v2770_v49 = vrot.slane %v4998_v2, %v2769_v42 }
0x1097   : > { %2666 = vrot.lane.b32.xlu1 %v2664_v51, %s4858_s1 }
0x1109   : > { %v2667_v56 = vpop.permute.xlu1 %2666 }
0x110a   : > { %v2669_v45 = vsel %vm2227_vm10, %v2663_v53, %v2667_v56 }
0x110b   : > { %4522 = vmatmul.mubr.msk.f32.vlgmr.msra.gmra.mrb[2].mxu0 %vm1785_vm9, %v2669_v45 }
0x110c   : > { %4543 = vmatprep.mubr.msk.f32.mxu0 %vm4851_vm8, %v4852_v50  ;;  %4668 = vmatpush3.bf16.msra.mxu0 %v4667_v1 }
0x110d   : > { %4669 = vmatprep.subr.bf16.mxu0 %v4850_v47 }
0x1110   : > { %4671 = vmatpush3.bf16.msra.mxu0 %v4670_v28 }
0x1111   : > { %4556 = vmatprep.subr.mxu0 %v4852_v50 }
0x11de   : > { %v2743_v57 = vpop.f32.mrb[2].mxu0 }
0x11df   : > { %v2744_v58 = vadd.f32 %v2743_v57, %v2673_v52  ;;  %v4523_v48 = vpop.f32.mrb[3].mxu0 }
0x11e1   : > { %v2747_v59 = vadd.f32 %v2744_v58, %v5249_v4  ;;  %v2772_v4 = vld [vmem:[#allocation2] sm:$0xff] }
0x11e2   : > { %4544 = vmatmul.mubr.msk.f32.vlgmr.msra.gmra.mrb[4].mxu0 %vm1785_vm9, %v2772_v4 }
0x11e3   : > { %v2748_v62 = vsel %vm1785_vm9, %v2747_v59, 0.0  ;;  %4558 = vmatprep.mubr.msk.f32.mxu0 %vm4851_vm8, %v4852_v50 }
0x11e4   : > { %2749 = vadd.xlane.f32.xlu1 %v2748_v62 }
0x1271   : > { %v2750_v24 = vpop.xlane.xlu1 %2749 }
0x1272   : > { %v2752_v36 = vmul.f32 0.03125, %v2750_v24 }
0x1274   : > { %v2753_v8 = vsub.f32 %v2747_v59, %v2752_v36 }
0x1276   : > { %v2754_v9 = vmul.f32 %v2753_v8, %v2753_v8 }
0x1278   : > { %v2755_v26 = vsel %vm1785_vm9, %v2754_v9, 0.0 }
0x1279   : > { %2756 = vadd.xlane.f32.xlu0 %v2755_v26 }
0x12b5   : > { %v2934_v34 = vpop.f32.mrb[4].mxu0 }
0x12b6   : > { %v5411_v38 = vadd.f32 %v2934_v34, %v2864_v35  ;;  %v4545_v37 = vpop.f32.mrb[5].mxu0 }
0x12b7   : > { %v2782_v37 = vrot.slane %v5000_v3, %v1783_v7 }
0x12b8   : > { %3060 = vrot.lane.b32.xlu0 %v5411_v38, %s4853_s19  ;;  %v3063_v56 = vcombine.high %v5411_v38, %v4852_v50  ;;  %v3070_v52 = vrot.slane %v5411_v38, %v5275_v61 }
0x12ba   : > { %v3077_v57 = vrot.slane %v3063_v56, %v5275_v61 }
0x1306   : > { %v2757_v39 = vpop.xlane.xlu0 %2756 }
0x1307   : > { %v2758_v40 = vmul.f32 0.03125, %v2757_v39 }
0x1309   : > { %v2759_v41 = vadd.f32 1e-05, %v2758_v40 }
0x130b   : > { %4785 = vrsqrt.f32 %v2759_v41 }
0x1315   : > { %v4786_v44 = vpop.eup %4785 }
0x1316   : > { %v2761_v46 = vmul.f32 %v4786_v44, %v2753_v8 }
0x1318   : > { %v2766_v5 = vmul.f32 %v2765_v43, %v2761_v46 }
0x131a   : > { %v5423_v51 = vadd.f32 %v2770_v49, %v2766_v5 }
0x131c   : > { %4533 = vmatmul.mubr.msk.f32.vlgmr.msra.gmra.mrb[8].mxu1 %vm1785_vm9, %v5423_v51 }
0x131d   : > { %4548 = vmatprep.mubr.msk.f32.mxu1 %vm4851_vm8, %v4852_v50 }
0x132a   : > { %v5429_v53 = vpop.permute.xlu0 %3060 }
0x132b   : > { %v3078_v45 = vcombine.high %v5429_v53, %v4852_v50  ;;  %v3085_v58 = vrot.slane %v5429_v53, %v5275_v61 }
0x132d   : > { %v3092_v48 = vrot.slane %v3078_v45, %v5275_v61  ;;  %v3093_v59 = vcombine.low %v3070_v52, %v3085_v58  ;;  %v3094_v62 = vcombine.high %v3070_v52, %v3085_v58 }
0x132f   : > { %v3109_v63 = vcombine.low %v3077_v57, %v3092_v48  ;;  %v3110_v60 = vcombine.high %v3077_v57, %v3092_v48  ;;  %v3101_v27 = vrot.slane %v3093_v59, %v5279_v0  ;;  %v3108_v1 = vrot.slane %v3094_v62, %v5279_v0 }
0x1331   : > { %v3117_v55 = vrot.slane %v3109_v63, %v5279_v0  ;;  %v3124_v28 = vrot.slane %v3110_v60, %v5279_v0  ;;  %v3129_v4 = vcombine.low %v3101_v27, %v3108_v1  ;;  %v4296_v24 = vcombine.high %v3101_v27, %v3108_v1 }
0x1333   : > { %v3145_v36 = vcombine.low %v3117_v55, %v3124_v28  ;;  %v4297_v8 = vcombine.high %v3117_v55, %v3124_v28  ;;  %v3136_v9 = vrot.slane %v3129_v4, %v5275_v61  ;;  %v3144_v26 = vrot.slane %v4296_v24, %v5275_v61 }
0x1335   : > { %v3152_v10 = vrot.slane %v3145_v36, %v5275_v61  ;;  %v3160_v11 = vrot.slane %v4297_v8, %v5275_v61  ;;  %v3161_v29 = vcombine.low %v3136_v9, %v3144_v26 }
0x1337   : > { %v3169_v30 = vcombine.low %v3152_v10, %v3160_v11  ;;  %v3168_v31 = vrot.slane %v3161_v29, %v5279_v0 }
0x1339   : > { %v3176_v32 = vrot.slane %v3169_v30, %v5279_v0 }
0x133b   : > { %v3177_v35 = vcombine.low %v3168_v31, %v3176_v32  ;;  %v3178_v34 = vcombine.high %v3168_v31, %v3176_v32 }
0x133d   : > { %4547 = vmatpush3.xpose.msk.msra.mxu1 %vm2227_vm10, %v3177_v35 }
0x133e   : > { %4551 = vmatprep.subr.mxu1 %v4852_v50 }
0x13ef   : > { %v2852_v39 = vpop.f32.mrb[8].mxu1 }
0x13f0   : > { %v2853_v40 = vadd.f32 %v2852_v39, %v2782_v37  ;;  %v4534_v41 = vpop.f32.mrb[9].mxu1 }
0x13f2   : > { %v2938_v43 = vmul.f32 0.25, %v2853_v40 }
0x13f4   : > { %2940 = vrot.lane.b32.xlu1 %v2938_v43, %s4853_s19  ;;  %v2943_v44 = vcombine.high %v2938_v43, %v4852_v50  ;;  %v2950_v49 = vrot.slane %v2938_v43, %v5275_v61 }
0x13f6   : > { %v2957_v45 = vrot.slane %v2943_v44, %v5275_v61 }
0x1466   : > { %v2941_v46 = vpop.permute.xlu1 %2940 }
0x1467   : > { %v2958_v5 = vcombine.high %v2941_v46, %v4852_v50  ;;  %v2965_v56 = vrot.slane %v2941_v46, %v5275_v61 }
0x1469   : > { %v2972_v52 = vrot.slane %v2958_v5, %v5275_v61  ;;  %v2973_v7 = vcombine.low %v2950_v49, %v2965_v56  ;;  %v2974_v57 = vcombine.high %v2950_v49, %v2965_v56 }
0x146b   : > { %v2981_v58 = vrot.slane %v2973_v7, %v5279_v0  ;;  %v2988_v48 = vrot.slane %v2974_v57, %v5279_v0  ;;  %v2989_v59 = vcombine.low %v2957_v45, %v2972_v52  ;;  %v2990_v62 = vcombine.high %v2957_v45, %v2972_v52 }
0x146d   : > { %v2997_v63 = vrot.slane %v2989_v59, %v5279_v0  ;;  %v3004_v60 = vrot.slane %v2990_v62, %v5279_v0  ;;  %v3009_v27 = vcombine.low %v2981_v58, %v2988_v48  ;;  %v4294_v1 = vcombine.high %v2981_v58, %v2988_v48 }
0x146f   : > { %v3016_v55 = vrot.slane %v3009_v27, %v5275_v61  ;;  %v3024_v28 = vrot.slane %v4294_v1, %v5275_v61  ;;  %v3025_v4 = vcombine.low %v2997_v63, %v3004_v60  ;;  %v4295_v24 = vcombine.high %v2997_v63, %v3004_v60 }
0x1471   : > { %v3032_v36 = vrot.slane %v3025_v4, %v5275_v61  ;;  %v3040_v8 = vrot.slane %v4295_v24, %v5275_v61  ;;  %v3041_v9 = vcombine.low %v3016_v55, %v3024_v28 }
0x1473   : > { %v3049_v26 = vcombine.low %v3032_v36, %v3040_v8  ;;  %v3048_v10 = vrot.slane %v3041_v9, %v5279_v0 }
0x1475   : > { %v3056_v11 = vrot.slane %v3049_v26, %v5279_v0 }
0x1477   : > { %v3057_v29 = vcombine.low %v3048_v10, %v3056_v11  ;;  %v3058_v30 = vcombine.high %v3048_v10, %v3056_v11 }
0x1479   : > { %4549 = vmatmul.mubr.msk.f32.vlgmr.msra.gmra.mrb[10].mxu1 %vm2227_vm10, %v3057_v29 }
0x147a   : > { %4552 = vmatpush3.xpose.msk.msra.mxu1 %vm2227_vm10, %v3178_v34  ;;  %4553 = vmatprep.mubr.msk.f32.mxu1 %vm4851_vm8, %v4852_v50 }
0x147b   : > { %4561 = vmatprep.subr.mxu1 %v4852_v50 }
0x147d   : > { %4554 = vmatmul.mubr.msk.f32.vlgmr.msra.gmra.mrb[12].mxu1 %vm2227_vm10, %v3058_v30 }
0x147e   : > { %4563 = vmatprep.mubr.msk.f32.mxu1 %vm4851_vm8, %v4852_v50 }
0x154c   : > { %v3373_v31 = vpop.f32.mrb[10].mxu1 }
0x154d   : > { %v4550_v32 = vpop.f32.mrb[11].mxu1  ;;  %v3453_v35 = vsel %vm2380_vm11, %v3373_v31, -inf }
0x154e   : > { %3454 = vmax.xlane.f32.xlu1 %v3453_v35 }
0x1550   : > { %v3449_v37 = vpop.f32.mrb[12].mxu1 }
0x1551   : > { %v4555_v39 = vpop.f32.mrb[13].mxu1  ;;  %v3456_v34 = vsel %vm2380_vm11, %v3449_v37, -inf }
0x1552   : > { %3457 = vmax.xlane.f32.xlu0 %v3456_v34 }
0x15db   : > { %v3455_v40 = vpop.xlane.xlu1 %3454 }
0x15dc   : > { %v3459_v41 = vsub.f32 %v3373_v31, %v3455_v40 }
0x15de   : > { %v3461_v43 = vmul.f32 1.442695, %v3459_v41 }
0x15df   : > { %v3458_v44 = vpop.xlane.xlu0 %3457 }
0x15e0   : > { %4787 = vpow2.f32 %v3461_v43  ;;  %v3460_v46 = vsub.f32 %v3449_v37, %v3458_v44 }
0x15e2   : > { %v3463_v49 = vmul.f32 1.442695, %v3460_v46 }
0x15e4   : > { %4789 = vpow2.f32 %v3463_v49 }
0x15ea   : > { %v4788_v5 = vpop.eup %4787 }
0x15eb   : > { %v3465_v56 = vsel %vm2380_vm11, %v4788_v5, 0.0 }
0x15ec   : > { %3466 = vadd.xlane.f32.xlu0 %v3465_v56  ;;  %v3744_v56 = vld [vmem:[%s3742_s24 + $0x8] sm:$0xff] }
0x15ee   : > { %v4790_v45 = vpop.eup %4789 }
0x15ef   : > { %v3468_v52 = vsel %vm2380_vm11, %v4790_v45, 0.0 }
0x15f0   : > { %3469 = vadd.xlane.f32.xlu1 %v3468_v52 }
0x1601   : > { %3181 = vrot.lane.b32.xlu1 %v5429_v53, %s4854_s26 }
0x1602   : > { %3179 = vrot.lane.b32.xlu0 %v5411_v38, %s4854_s26 }
0x1679   : > { %v3467_v7 = vpop.xlane.xlu0 %3466 }
0x167a   : > { %4791 = vrcp.f32 %v3467_v7  ;;  %v3746_v7 = vld [vmem:[%s3742_s24 + $0x18] sm:$0xff] }
0x167d   : > { %v3470_v57 = vpop.xlane.xlu1 %3469  ;;  %v3180_v58 = vpop.permute.xlu0 %3179 }
0x167e   : > { %v3185_v48 = vcombine.high %v3180_v58, %v4852_v50  ;;  %v3192_v62 = vrot.slane %v3180_v58, %v5275_v61  ;;  %4793 = vrcp.f32 %v3470_v57 }
0x1680   : > { %v3199_v27 = vrot.slane %v3185_v48, %v5275_v61 }
0x1681   : > { %v3182_v59 = vpop.permute.xlu1 %3181 }
0x1682   : > { %v3200_v63 = vcombine.high %v3182_v59, %v4852_v50  ;;  %v3207_v60 = vrot.slane %v3182_v59, %v5275_v61 }
0x1684   : > { %v3214_v53 = vrot.slane %v3200_v63, %v5275_v61  ;;  %v3215_v1 = vcombine.low %v3192_v62, %v3207_v60  ;;  %v3216_v55 = vcombine.high %v3192_v62, %v3207_v60  ;;  %v4792_v37 = vpop.eup %4791 }
0x1685   : > { %v3472_v46 = vmul.f32 %v4792_v37, %v4788_v5  ;;  %v3743_v5 = vld [vmem:[%s3742_s24] sm:$0xff] }
0x1686   : > { %v3223_v38 = vrot.slane %v3215_v1, %v5279_v0  ;;  %v3230_v28 = vrot.slane %v3216_v55, %v5279_v0  ;;  %v3231_v4 = vcombine.low %v3199_v27, %v3214_v53  ;;  %v3232_v24 = vcombine.high %v3199_v27, %v3214_v53 }
0x1687   : > { %v4673_v52 = vpack.c.bf16 %v3744_v56, %v3743_v5 }
0x1688   : > { %v3239_v36 = vrot.slane %v3231_v4, %v5279_v0  ;;  %v3246_v8 = vrot.slane %v3232_v24, %v5279_v0  ;;  %v3251_v9 = vcombine.low %v3223_v38, %v3230_v28  ;;  %v4298_v26 = vcombine.high %v3223_v38, %v3230_v28  ;;  %v4794_v34 = vpop.eup %4793 }
0x1689   : > { %v3474_v49 = vmul.f32 %v4794_v34, %v4790_v45  ;;  %v3745_v45 = vld [vmem:[%s3742_s24 + $0x10] sm:$0xff] }
0x168a   : > { %v3258_v10 = vrot.slane %v3251_v9, %v5275_v61  ;;  %v3266_v11 = vrot.slane %v4298_v26, %v5275_v61  ;;  %v3267_v29 = vcombine.low %v3239_v36, %v3246_v8  ;;  %v4299_v30 = vcombine.high %v3239_v36, %v3246_v8 }
0x168b   : > { %v4676_v57 = vpack.c.bf16 %v3746_v7, %v3745_v45 }
0x168c   : > { %v3274_v31 = vrot.slane %v3267_v29, %v5275_v61  ;;  %v3282_v32 = vrot.slane %v4299_v30, %v5275_v61  ;;  %v3283_v35 = vcombine.low %v3258_v10, %v3266_v11 }
0x168e   : > { %v3291_v39 = vcombine.low %v3274_v31, %v3282_v32  ;;  %v3290_v40 = vrot.slane %v3283_v35, %v5279_v0 }
0x1690   : > { %v3298_v41 = vrot.slane %v3291_v39, %v5279_v0 }
0x1692   : > { %v3299_v43 = vcombine.low %v3290_v40, %v3298_v41  ;;  %v3300_v44 = vcombine.high %v3290_v40, %v3298_v41 }
0x1694   : > { %4557 = vmatpush3.msra.mxu0 %v3299_v43  ;;  %4562 = vmatpush3.msra.mxu1 %v3300_v44 }
0x1695   : > { %4559 = vmatmul.mubr.msk.f32.vlgmr.msra.gmra.mrb[6].mxu0 %vm2380_vm11, %v3472_v46  ;;  %4564 = vmatmul.mubr.msk.f32.vlgmr.msra.gmra.mrb[14].mxu1 %vm2380_vm11, %v3474_v49 }
0x1696   : > { %4672 = vmatprep.subr.bf16.mxu0 %v4850_v47  ;;  %4574 = vmatprep.mubr.msk.f32.mxu0 %vm4851_vm8, %v4852_v50 }
0x1697   : > { %4678 = vmatprep.subr.bf16.mxu1 %v4850_v47  ;;  %4585 = vmatprep.mubr.msk.f32.mxu1 %vm4851_vm8, %v4852_v50 }
0x1698   : > { %4674 = vmatpush3.bf16.msra.mxu0 %v4673_v52 }
0x1699   : > { %4675 = vmatprep.subr.bf16.mxu0 %v4850_v47 }
0x169c   : > { %4677 = vmatpush3.bf16.msra.mxu0 %v4676_v57 }
0x169d   : > { %4684 = vmatprep.subr.bf16.mxu0 %v4850_v47 }
0x1768   : > { %v3544_v58 = vpop.f32.mrb[6].mxu0  ;;  %v3617_v48 = vpop.f32.mrb[14].mxu1 }
0x1769   : > { %v3621_v59 = vcombine.high %v3544_v58, %v4852_v50  ;;  %v3628_v62 = vrot.slane %v3544_v58, %v5275_v61  ;;  %v3636_v63 = vcombine.high %v3617_v48, %v4852_v50  ;;  %v3643_v60 = vrot.slane %v3617_v48, %v5275_v61  ;;  %v4560_v27 = vpop.f32.mrb[7].mxu0  ;;  %v4565_v53 = vpop.f32.mrb[15].mxu1 }
0x176b   : > { %v3635_v1 = vrot.slane %v3621_v59, %v5275_v61  ;;  %v3650_v55 = vrot.slane %v3636_v63, %v5275_v61  ;;  %v3651_v38 = vcombine.low %v3628_v62, %v3643_v60  ;;  %v3652_v28 = vcombine.high %v3628_v62, %v3643_v60 }
0x176c   : > { %v4688_v62 = vpack.c.bf16 %v5042_v19, %v5040_v18  ;;  %v3846_v19 = vrot.slane %v5000_v3, %v2769_v42  ;;  %v3851_v63 = vrot.slane %v4998_v2, %v2863_v33 }
0x176d   : > { %v3659_v4 = vrot.slane %v3651_v38, %v5279_v0  ;;  %v3666_v24 = vrot.slane %v3652_v28, %v5279_v0  ;;  %v3667_v36 = vcombine.low %v3635_v1, %v3650_v55  ;;  %v3668_v8 = vcombine.high %v3635_v1, %v3650_v55 }
0x176f   : > { %v3675_v9 = vrot.slane %v3667_v36, %v5279_v0  ;;  %v3682_v26 = vrot.slane %v3668_v8, %v5279_v0  ;;  %v3687_v10 = vcombine.low %v3659_v4, %v3666_v24  ;;  %v4306_v11 = vcombine.high %v3659_v4, %v3666_v24 }
0x1771   : > { %v3694_v29 = vrot.slane %v3687_v10, %v5275_v61  ;;  %v3702_v30 = vrot.slane %v4306_v11, %v5275_v61  ;;  %v3703_v31 = vcombine.low %v3675_v9, %v3682_v26  ;;  %v4307_v32 = vcombine.high %v3675_v9, %v3682_v26 }
0x1772   : > { %v4020_v10 = vsub.s32 6, %v5256_v6  ;;  %v4025_v11 = vsub.s32 7, %v5256_v6 }
0x1773   : > { %v3710_v35 = vrot.slane %v3703_v31, %v5275_v61  ;;  %v3718_v37 = vrot.slane %v4307_v32, %v5275_v61  ;;  %v3719_v39 = vcombine.low %v3694_v29, %v3702_v30  ;;  %v3750_v61 = vrot.slane %v5000_v3, %v2672_v54 }
0x1774   : > { %v4682_v54 = vpack.c.bf16 %v5034_v15, %v5032_v14  ;;  %v4021_v29 = vrot.slane %v4998_v2, %v4020_v10  ;;  %v4026_v31 = vrot.slane %v4998_v2, %v4025_v11 }
0x1775   : > { %v3727_v34 = vcombine.low %v3710_v35, %v3718_v37  ;;  %v3726_v40 = vrot.slane %v3719_v39, %v5279_v0 }
0x1777   : > { %v3734_v41 = vrot.slane %v3727_v34, %v5279_v0 }
0x1779   : > { %v3736_v43 = vcombine.high %v3726_v40, %v3734_v41  ;;  %v3735_v44 = vcombine.low %v3726_v40, %v3734_v41 }
0x177b   : > { %3738 = vrot.lane.b32.xlu1 %v3736_v43, %s4858_s1 }
0x17ed   : > { %v3739_v46 = vpop.permute.xlu1 %3738 }
0x17ee   : > { %v3741_v49 = vsel %vm2227_vm10, %v3735_v44, %v3739_v46 }
0x17ef   : > { %4575 = vmatmul.mubr.msk.f32.vlgmr.msra.gmra.mrb[8].mxu0 %vm1785_vm9, %v3741_v49 }
0x17f0   : > { %4604 = vmatprep.mubr.msk.f32.mxu0 %vm4851_vm8, %v4852_v50  ;;  %v4679_v50 = vpack.c.bf16 %v5030_v13, %v5028_v12  ;;  %v4691_v12 = vpack.c.bf16 %v5046_v21, %v5044_v20 }
0x17f2   : > { %4680 = vmatpush3.bf16.msra.mxu1 %v4679_v50 }
0x17f3   : > { %4681 = vmatprep.subr.bf16.mxu1 %v4850_v47 }
0x17f6   : > { %4683 = vmatpush3.bf16.msra.mxu1 %v4682_v54 }
0x18c2   : > { %v3820_v5 = vpop.f32.mrb[8].mxu0 }
0x18c3   : > { %v3821_v56 = vadd.f32 %v3820_v5, %v3750_v61  ;;  %v4576_v45 = vpop.f32.mrb[9].mxu0 }
0x18c5   : > { %v3824_v0 = vadd.f32 %v3821_v56, %v5423_v51  ;;  %v4685_v51 = vpack.c.bf16 %v5038_v17, %v5036_v16  ;;  %v3841_v16 = vrot.slane %v5000_v3, %v2764_v25  ;;  %v3928_v3 = vsub.s32 5, %v5256_v6 }
0x18c7   : > { %v3825_v52 = vsel %vm1785_vm9, %v3824_v0, 0.0  ;;  %4686 = vmatpush3.bf16.msra.mxu0 %v4685_v51  ;;  %v3929_v42 = vrot.slane %v4998_v2, %v3928_v3 }
0x18c8   : > { %3826 = vadd.xlane.f32.xlu0 %v3825_v52  ;;  %4687 = vmatprep.subr.bf16.mxu0 %v4850_v47 }
0x18cb   : > { %4689 = vmatpush3.bf16.msra.mxu0 %v4688_v62 }
0x18cc   : > { %4690 = vmatprep.subr.bf16.mxu0 %v4850_v47 }
0x18cf   : > { %4692 = vmatpush3.bf16.msra.mxu0 %v4691_v12 }
0x18d0   : > { %4693 = vmatprep.subr.bf16.mxu0 %v4850_v47  ;;  %v4694_v47 = vpack.c.bf16 %v5050_v23, %v5048_v22 }
0x18d3   : > { %4695 = vmatpush3.bf16.msra.mxu0 %v4694_v47 }
0x1955   : > { %v3827_v7 = vpop.xlane.xlu0 %3826 }
0x1956   : > { %v3828_v57 = vmul.f32 0.03125, %v3827_v7 }
0x1958   : > { %v3829_v58 = vsub.f32 %v3824_v0, %v3828_v57 }
0x195a   : > { %v3830_v48 = vmul.f32 %v3829_v58, %v3829_v58 }
0x195c   : > { %v3831_v59 = vsel %vm1785_vm9, %v3830_v48, 0.0 }
0x195d   : > { %3832 = vadd.xlane.f32.xlu1 %v3831_v59 }
0x19ea   : > { %v3833_v13 = vpop.xlane.xlu1 %3832 }
0x19eb   : > { %v3834_v14 = vmul.f32 0.03125, %v3833_v13 }
0x19ed   : > { %v3835_v15 = vadd.f32 1e-05, %v3834_v14 }
0x19ef   : > { %4795 = vrsqrt.f32 %v3835_v15 }
0x19f9   : > { %v4796_v17 = vpop.eup %4795 }
0x19fa   : > { %v3837_v18 = vmul.f32 %v4796_v17, %v3829_v58 }
0x19fc   : > { %v3842_v20 = vmul.f32 %v3841_v16, %v3837_v18 }
0x19fe   : > { %v3847_v21 = vadd.f32 %v3846_v19, %v3842_v20 }
0x1a00   : > { %4586 = vmatmul.mubr.msk.f32.vlgmr.msra.gmra.mrb[16].mxu1 %vm1785_vm9, %v3847_v21 }
0x1ad3   : > { %v3921_v60 = vpop.f32.mrb[16].mxu1 }
0x1ad4   : > { %v3922_v25 = vadd.f32 %v3921_v60, %v3851_v63  ;;  %v4587_v27 = vpop.f32.mrb[17].mxu1 }
0x1ad6   : > { %v3925_v53 = vmax.f32 %v3922_v25, 0.0 }
0x1ad8   : > { %4605 = vmatmul.mubr.msk.f32.vlgmr.msra.gmra.mrb[10].mxu0 %vm3930_vm12, %v3925_v53 }
0x1bab   : > { %v4000_v1 = vpop.f32.mrb[10].mxu0 }
0x1bac   : > { %v4001_v55 = vadd.f32 %v4000_v1, %v3929_v42  ;;  %v4606_v38 = vpop.f32.mrb[11].mxu0 }
0x1bae   : > { %v4004_v28 = vadd.f32 %v4001_v55, %v3847_v21 }
0x1bb0   : > { %v4005_v22 = vsel %vm1785_vm9, %v4004_v28, 0.0 }
0x1bb1   : > { %4006 = vadd.xlane.f32.xlu0 %v4005_v22 }
0x1c3e   : > { %v4007_v23 = vpop.xlane.xlu0 %4006 }
0x1c3f   : > { %v4008_v4 = vmul.f32 0.03125, %v4007_v23 }
0x1c41   : > { %v4009_v33 = vsub.f32 %v4004_v28, %v4008_v4 }
0x1c43   : > { %v4010_v24 = vmul.f32 %v4009_v33, %v4009_v33 }
0x1c45   : > { %v4011_v36 = vsel %vm1785_vm9, %v4010_v24, 0.0 }
0x1c46   : > { %4012 = vadd.xlane.f32.xlu0 %v4011_v36 }
0x1cd3   : > { %v4013_v8 = vpop.xlane.xlu0 %4012 }
0x1cd4   : > { %v4014_v9 = vmul.f32 0.03125, %v4013_v8 }
0x1cd6   : > { %v4015_v26 = vadd.f32 1e-05, %v4014_v9 }
0x1cd8   : > { %4797 = vrsqrt.f32 %v4015_v26 }
0x1ce2   : > { %v4798_v30 = vpop.eup %4797 }
0x1ce3   : > { %v4017_v32 = vmul.f32 %v4798_v30, %v4009_v33 }
0x1ce5   : > { %v4022_v35 = vmul.f32 %v4021_v29, %v4017_v32 }
0x1ce7   : > { %v4027_v37 = vadd.f32 %v4026_v31, %v4022_v35 }
0x1ce9   : > { %4028 = vst.msk [vmem:[#allocation3] sm:$0xff] %vm1785_vm9, %v4027_v37 }
0x1cea PF: > { %p4311_p11 = scmp.ne.s32.totalorder %s4823_s18, 3 }
0x1ceb   : > { %vm4036_vm13 = vcmask (!%p4311_p11), 261120   ;;  %v4061_v44 = vld [vmem:[%s5639_s13] sm:$0xff] (!%p4311_p11)  ;;  %v4062_v46 = vld [vmem:[%s5639_s13 + $0x8] sm:$0xff] (!%p4311_p11)  ;;  %v4063_v49 = vld [vmem:[%s5639_s13 + $0x10] sm:$0xff] (!%p4311_p11)  ;;  %v4859_v61 = vmov (!%p4311_p11), 0.0|0.0   ;;  %vm4860_vm14 = vmmov (!%p4311_p11), 0   ;;  %s5652_s0 = scalar_lea.vmem (!%p4311_p11), %s5641_s15, %s4974_s25 }
0x1cec   : > { %4032 = sbr.rel (%p4311_p11) target bundleno = 7937 (0x1f01), region = 104  ;;  %4696 = vmatprep.subr.bf16.mxu0 (!%p4311_p11), %v4859_v61  ;;  %v4697_v5 = vpack.c.bf16 (!%p4311_p11), %v4062_v46, %v4061_v44  ;;  %v4064_v56 = vld [vmem:[%s5639_s13 + $0x18] sm:$0xff] (!%p4311_p11)  ;;  %v4861_v45 = vmov (!%p4311_p11), 0.0   ;;  %v4312_v48 = vld [vmem:[%s5638_s12 + $0x2] ss:$0 sm:$0xff] (!%p4311_p11) }
0x1ced   : > { %4615 = vmatprep.mubr.msk.f32.mxu0 (!%p4311_p11), %vm4860_vm14, %v4861_v45  ;;  %v4700_v0 = vpack.c.bf16 (!%p4311_p11), %v4064_v56, %v4063_v49  ;;  %v4313_v50 = vld [vmem:[%s5638_s12 + $0x3] ss:$0 sm:$0xff] (!%p4311_p11)  ;;  %v4314_v62 = vld [vmem:[%s5640_s14] ss:$0 sm:$0xff] (!%p4311_p11) }
0x1cee   : > { %4698 = vmatpush3.bf16.msra.mxu0 (!%p4311_p11), %v4697_v5 }
0x1cef   : > { %4699 = vmatprep.subr.bf16.mxu0 (!%p4311_p11), %v4859_v61 }
0x1cf0   : > { %v4033_v39 = vld [vmem:[#allocation3] sm:$0xff] (!%p4311_p11) }
0x1cf1   : > { %v4037_v34 = vsel (!%p4311_p11), %vm4036_vm13, %v4033_v39, 0.0 }
0x1cf2   : > { %4038 = vadd.xlane.f32.xlu0 (!%p4311_p11), %v4037_v34  ;;  %4701 = vmatpush3.bf16.msra.mxu0 (!%p4311_p11), %v4700_v0 }
0x1d7f   : > { %v4039_v6 = vpop.xlane.xlu0 %4038 }
0x1d80   : > { %v4041_v40 = vmul.f32 0.03125, %v4039_v6 }
0x1d82   : > { %v4042_v41 = vsub.f32 %v4033_v39, %v4041_v40 }
0x1d84   : > { %v4043_v43 = vmul.f32 %v4042_v41, %v4042_v41 }
0x1d86   : > { %v4044_v2 = vsel %vm4036_vm13, %v4043_v43, 0.0 }
0x1d87   : > { %4045 = vadd.xlane.f32.xlu0 %v4044_v2 }
0x1e14   : > { %v4046_v52 = vpop.xlane.xlu0 %4045 }
0x1e15   : > { %v4047_v7 = vmul.f32 0.03125, %v4046_v52 }
0x1e17   : > { %v4048_v57 = vadd.f32 1e-05, %v4047_v7 }
0x1e19   : > { %4799 = vrsqrt.f32 %v4048_v57 }
0x1e23   : > { %v4800_v58 = vpop.eup %4799 }
0x1e24   : > { %v4050_v59 = vmul.f32 %v4800_v58, %v4042_v41 }
0x1e26   : > { %v4055_v54 = vmul.f32 %v4312_v48, %v4050_v59 }
0x1e28   : > { %v4060_v51 = vadd.f32 %v4313_v50, %v4055_v54 }
0x1e2a   : > { %4616 = vmatmul.mubr.msk.f32.vlgmr.msra.gmra.mrb[0].mxu0 %vm4036_vm13, %v4060_v51 }
0x1efd   : > { %v4141_v12 = vpop.f32.mrb[0].mxu0 }
0x1efe   : > { %v4142_v13 = vadd.f32 %v4314_v62, %v4141_v12  ;;  %v4617_v14 = vpop.f32.mrb[1].mxu0 }
0x1f00   : > { %4145 = vst [vmem:[%s5652_s0] sm:$0xff] %v4142_v13 }
0x1f01 PF: > { %s25_s22 = sadd.s32 1, %s4839_s22   ;;  %s5653_s18 = sld [smem:[#allocation4_spill]] }
0x1f02   : > { %p22_p12 = scmp.ge.s32.totalorder %s25_s22, 10   ;;  %s5654_s19 = sld [smem:[#allocation5_spill]] }
0x1f03   : > { %s5655_s20 = sld [smem:[#allocation6_spill]]  ;;  %s5656_s21 = sld [smem:[#allocation7_spill]] }
0x1f04   :  { %24 = sbr.rel (!%p22_p12) target bundleno = 4 (0x4), region = 145 }

</bundles_post_ra>
